<compile_context>
chip_gen: v7x
topology: tpu7x:2x2x1
jax: 0.10.0
libtpu: 0.0.40
codegen_flags: <defaults>
</compile_context>

<pallas_src>
import jax
import jax.numpy as jnp
from jax.experimental import pallas as pl
from jax.experimental.pallas import tpu as pltpu

LATENT_DIM = 100      # nn.Linear(100, 128)
LATENT_PAD = 128      # next multiple of 128
OUT_DIM = 784         # 28 * 28
OUT_PAD = 896         # 7 * 128  (lane-dense output slab)
LEAKY_SLOPE = 0.001   # matches nn.LeakyReLU(0.001) in the spec


def _round_up(n, m):
    return ((n + m - 1) // m) * m


def _leaky_relu(x, slope=LEAKY_SLOPE):
    return jnp.where(x > 0, x, slope * x)


def generator_kernel(x_ref,
                     w1_ref, b1_ref,
                     w2_ref, b2_ref,
                     w3_ref, b3_ref,
                     w4_ref, b4_ref,
                     out_ref):
    """Fused 4-layer MLP: Linear -> LeakyReLU (x3) -> Linear -> Tanh.

    Activations are cast to bf16 only at each MXU input; accumulation and all
    elementwise math stay f32.
    """
    x = x_ref[...].astype(jnp.bfloat16)                                 # (TB, 128)
    h = jnp.dot(x, w1_ref[...],
                preferred_element_type=jnp.float32) + b1_ref[...]
    h = _leaky_relu(h)                                                  # (TB, 128)
    h = jnp.dot(h.astype(jnp.bfloat16), w2_ref[...],
                preferred_element_type=jnp.float32) + b2_ref[...]
    h = _leaky_relu(h)                                                  # (TB, 256)
    h = jnp.dot(h.astype(jnp.bfloat16), w3_ref[...],
                preferred_element_type=jnp.float32) + b3_ref[...]
    h = _leaky_relu(h)                                                  # (TB, 512)
    h = jnp.dot(h.astype(jnp.bfloat16), w4_ref[...],
                preferred_element_type=jnp.float32) + b4_ref[...]
    out_ref[...] = jnp.tanh(h)                                          # (TB, 896)


def generator_forward(x, params, tile_b=256):
    """x: (B, 100) float32 -> (B, 1, 28, 28) float32."""
    B = x.shape[0]
    w1, b1, w2, b2, w3, b3, w4, b4 = params

    # Batch tile: multiple of 8 (sublanes), capped at `tile_b` (>=128 rows
    # fills the MXU when the batch is large enough). tile_b=256 keeps the
    # per-step VMEM footprint well under v7x's smaller scoped limit.
    tile_b = min(tile_b, _round_up(B, 8))
    b_pad = _round_up(B, tile_b)

    # Zero-pad latent 100 -> 128 and batch -> multiple of tile_b.
    x_pad = jnp.zeros((b_pad, LATENT_PAD), jnp.float32)
    x_pad = x_pad.at[:B, :LATENT_DIM].set(x)

    grid = (b_pad // tile_b,)
    resident = lambda shape: pl.BlockSpec(shape, lambda i: (0, 0))

    out_flat = pl.pallas_call(
        generator_kernel,
        out_shape=jax.ShapeDtypeStruct((b_pad, OUT_PAD), jnp.float32),
        grid=grid,
        in_specs=[
            pl.BlockSpec((tile_b, LATENT_PAD), lambda i: (i, 0)),   # x tile
            resident((LATENT_PAD, 128)), resident((1, 128)),        # w1, b1
            resident((128, 256)),        resident((1, 256)),        # w2, b2
            resident((256, 512)),        resident((1, 512)),        # w3, b3
            resident((512, OUT_PAD)),    resident((1, OUT_PAD)),    # w4, b4
        ],
        out_specs=pl.BlockSpec((tile_b, OUT_PAD), lambda i: (i, 0)),
        compiler_params=pltpu.CompilerParams(
            dimension_semantics=("parallel",)),
    )(x_pad, w1, b1, w2, b2, w3, b3, w4, b4)

    # Drop lane / batch padding; matches PyTorch out = x.view(B, 1, 28, 28).
    return out_flat[:B, :OUT_DIM].reshape(B, 1, 28, 28)


def init_params(key):
    """nn.Linear-style init (uniform +/- 1/sqrt(fan_in)).

    Weights stored transposed (in_features, out_features) so the kernel
    computes x @ W + b, cast to bf16, and zero-padded to lane-aligned shapes
    (w1: (100,128)->(128,128); w4: (512,784)->(512,896)). Biases stay f32,
    shape (1, out_padded), with zero padding (tanh(0)=0 in padded lanes).
    """
    dims = [(100, 128), (128, 256), (256, 512), (512, 784)]
    pads = [(LATENT_PAD, 128), (128, 256), (256, 512), (512, OUT_PAD)]
    params = []
    for (fan_in, fan_out), (pin, pout) in zip(dims, pads):
        key, kw, kb = jax.random.split(key, 3)
        bound = 1.0 / jnp.sqrt(jnp.float32(fan_in))
        w = jax.random.uniform(kw, (fan_in, fan_out), jnp.float32, -bound, bound)
        b = jax.random.uniform(kb, (1, fan_out), jnp.float32, -bound, bound)
        w_pad = jnp.zeros((pin, pout), jnp.float32).at[:fan_in, :fan_out].set(w)
        b_pad = jnp.zeros((1, pout), jnp.float32).at[:, :fan_out].set(b)
        params.extend([w_pad.astype(jnp.bfloat16), b_pad])
    return tuple(params)


def reference_forward(x, params):
    """Pure-JAX reference using the same bf16-weight / f32-accum math."""
    w1, b1, w2, b2, w3, b3, w4, b4 = params
    B = x.shape[0]
    h = x.astype(jnp.bfloat16)
    h = _leaky_relu(jnp.dot(h, w1[:LATENT_DIM],
                            preferred_element_type=jnp.float32) + b1)
    h = _leaky_relu(jnp.dot(h.astype(jnp.bfloat16), w2,
                            preferred_element_type=jnp.float32) + b2)
    h = _leaky_relu(jnp.dot(h.astype(jnp.bfloat16), w3,
                            preferred_element_type=jnp.float32) + b3)
    h = jnp.tanh(jnp.dot(h.astype(jnp.bfloat16), w4,
                         preferred_element_type=jnp.float32) + b4)
    return h[:, :OUT_DIM].reshape(B, 1, 28, 28)


if __name__ == "__main__":
    key = jax.random.PRNGKey(0)
    key, kx = jax.random.split(key)

    B = 8  # latent dim is fixed at 100 by the module
    x = jax.random.normal(kx, (B, 100), dtype=jnp.float32)
    params = init_params(key)

    out = jax.block_until_ready(generator_forward(x, params))
    ref = reference_forward(x, params)

    assert out.shape == (B, 1, 28, 28), out.shape
    max_err = float(jnp.max(jnp.abs(out - ref)))
    assert jnp.allclose(out, ref, atol=1e-3, rtol=1e-3), max_err

    print("KERNEL_OK")
</pallas_src>

<mosaic_0001>
module attributes {stable_mosaic.version = 11 : i64} {
  func.func @generator_kernel(%arg0: i32, %arg1: memref<8x128xf32, #tpu.memory_space<vmem>>, %arg2: memref<128x128xbf16, #tpu.memory_space<vmem>>, %arg3: memref<1x128xf32, #tpu.memory_space<vmem>>, %arg4: memref<128x256xbf16, #tpu.memory_space<vmem>>, %arg5: memref<1x256xf32, #tpu.memory_space<vmem>>, %arg6: memref<256x512xbf16, #tpu.memory_space<vmem>>, %arg7: memref<1x512xf32, #tpu.memory_space<vmem>>, %arg8: memref<512x896xbf16, #tpu.memory_space<vmem>>, %arg9: memref<1x896xf32, #tpu.memory_space<vmem>>, %arg10: memref<8x896xf32, #tpu.memory_space<vmem>>) attributes {dimension_semantics = [#tpu.dimension_semantics<parallel>], iteration_bounds = array<i64: 1>, scalar_prefetch = 0 : i64, scratch_operands = 0 : i64, tpu.core_type = #tpu.core_type<tc>, window_params = [{transform_indices = @transform_0, window_bounds = array<i64: 8, 128>}, {pipeline_mode = #tpu.pipeline_mode<synchronous>, transform_indices = @transform_1, window_bounds = array<i64: 128, 128>}, {pipeline_mode = #tpu.pipeline_mode<synchronous>, transform_indices = @transform_2, window_bounds = array<i64: 1, 128>}, {pipeline_mode = #tpu.pipeline_mode<synchronous>, transform_indices = @transform_3, window_bounds = array<i64: 128, 256>}, {pipeline_mode = #tpu.pipeline_mode<synchronous>, transform_indices = @transform_4, window_bounds = array<i64: 1, 256>}, {pipeline_mode = #tpu.pipeline_mode<synchronous>, transform_indices = @transform_5, window_bounds = array<i64: 256, 512>}, {pipeline_mode = #tpu.pipeline_mode<synchronous>, transform_indices = @transform_6, window_bounds = array<i64: 1, 512>}, {pipeline_mode = #tpu.pipeline_mode<synchronous>, transform_indices = @transform_7, window_bounds = array<i64: 512, 896>}, {pipeline_mode = #tpu.pipeline_mode<synchronous>, transform_indices = @transform_8, window_bounds = array<i64: 1, 896>}, {transform_indices = @transform_9, window_bounds = array<i64: 8, 896>}]} {
    %c0 = arith.constant 0 : index
    %c0_0 = arith.constant 0 : index
    %0 = vector.load %arg1[%c0, %c0_0] : memref<8x128xf32, #tpu.memory_space<vmem>>, vector<8x128xf32>
    %1 = arith.truncf %0 : vector<8x128xf32> to vector<8x128xbf16>
    %c0_1 = arith.constant 0 : index
    %c0_2 = arith.constant 0 : index
    %2 = vector.load %arg2[%c0_1, %c0_2] : memref<128x128xbf16, #tpu.memory_space<vmem>>, vector<128x128xbf16>
    %cst = arith.constant dense<0.000000e+00> : vector<8x128xf32>
    %3 = tpu.matmul %1, %2, %cst {dimension_numbers = #tpu.dot_dimension_numbers<[1], [0], [0], [1], [0, 0, 1, 1], [], []>} : vector<8x128xbf16>, vector<128x128xbf16>, vector<8x128xf32> -> vector<8x128xf32>
    %c0_3 = arith.constant 0 : index
    %c0_4 = arith.constant 0 : index
    %4 = vector.load %arg3[%c0_3, %c0_4] : memref<1x128xf32, #tpu.memory_space<vmem>>, vector<1x128xf32>
    %5 = vector.broadcast %4 : vector<1x128xf32> to vector<8x128xf32>
    %6 = arith.addf %3, %5 : vector<8x128xf32>
    %cst_5 = arith.constant 0.000000e+00 : f32
    %7 = vector.broadcast %cst_5 : f32 to vector<8x128xf32>
    %8 = arith.cmpf ogt, %6, %7 : vector<8x128xf32>
    %cst_6 = arith.constant 1.000000e-03 : f32
    %9 = vector.broadcast %cst_6 : f32 to vector<8x128xf32>
    %10 = arith.mulf %9, %6 : vector<8x128xf32>
    %11 = arith.select %8, %6, %10 : vector<8x128xi1>, vector<8x128xf32>
    %12 = arith.truncf %11 : vector<8x128xf32> to vector<8x128xbf16>
    %c0_7 = arith.constant 0 : index
    %c0_8 = arith.constant 0 : index
    %13 = vector.load %arg4[%c0_7, %c0_8] : memref<128x256xbf16, #tpu.memory_space<vmem>>, vector<128x256xbf16>
    %cst_9 = arith.constant dense<0.000000e+00> : vector<8x256xf32>
    %14 = tpu.matmul %12, %13, %cst_9 {dimension_numbers = #tpu.dot_dimension_numbers<[1], [0], [0], [1], [0, 0, 1, 1], [], []>} : vector<8x128xbf16>, vector<128x256xbf16>, vector<8x256xf32> -> vector<8x256xf32>
    %c0_10 = arith.constant 0 : index
    %c0_11 = arith.constant 0 : index
    %15 = vector.load %arg5[%c0_10, %c0_11] : memref<1x256xf32, #tpu.memory_space<vmem>>, vector<1x256xf32>
    %16 = vector.broadcast %15 : vector<1x256xf32> to vector<8x256xf32>
    %17 = arith.addf %14, %16 : vector<8x256xf32>
    %cst_12 = arith.constant 0.000000e+00 : f32
    %18 = vector.broadcast %cst_12 : f32 to vector<8x256xf32>
    %19 = arith.cmpf ogt, %17, %18 : vector<8x256xf32>
    %cst_13 = arith.constant 1.000000e-03 : f32
    %20 = vector.broadcast %cst_13 : f32 to vector<8x256xf32>
    %21 = arith.mulf %20, %17 : vector<8x256xf32>
    %22 = arith.select %19, %17, %21 : vector<8x256xi1>, vector<8x256xf32>
    %23 = arith.truncf %22 : vector<8x256xf32> to vector<8x256xbf16>
    %c0_14 = arith.constant 0 : index
    %c0_15 = arith.constant 0 : index
    %24 = vector.load %arg6[%c0_14, %c0_15] : memref<256x512xbf16, #tpu.memory_space<vmem>>, vector<256x512xbf16>
    %cst_16 = arith.constant dense<0.000000e+00> : vector<8x512xf32>
    %25 = tpu.matmul %23, %24, %cst_16 {dimension_numbers = #tpu.dot_dimension_numbers<[1], [0], [0], [1], [0, 0, 1, 1], [], []>} : vector<8x256xbf16>, vector<256x512xbf16>, vector<8x512xf32> -> vector<8x512xf32>
    %c0_17 = arith.constant 0 : index
    %c0_18 = arith.constant 0 : index
    %26 = vector.load %arg7[%c0_17, %c0_18] : memref<1x512xf32, #tpu.memory_space<vmem>>, vector<1x512xf32>
    %27 = vector.broadcast %26 : vector<1x512xf32> to vector<8x512xf32>
    %28 = arith.addf %25, %27 : vector<8x512xf32>
    %cst_19 = arith.constant 0.000000e+00 : f32
    %29 = vector.broadcast %cst_19 : f32 to vector<8x512xf32>
    %30 = arith.cmpf ogt, %28, %29 : vector<8x512xf32>
    %cst_20 = arith.constant 1.000000e-03 : f32
    %31 = vector.broadcast %cst_20 : f32 to vector<8x512xf32>
    %32 = arith.mulf %31, %28 : vector<8x512xf32>
    %33 = arith.select %30, %28, %32 : vector<8x512xi1>, vector<8x512xf32>
    %34 = arith.truncf %33 : vector<8x512xf32> to vector<8x512xbf16>
    %c0_21 = arith.constant 0 : index
    %c0_22 = arith.constant 0 : index
    %35 = vector.load %arg8[%c0_21, %c0_22] : memref<512x896xbf16, #tpu.memory_space<vmem>>, vector<512x896xbf16>
    %cst_23 = arith.constant dense<0.000000e+00> : vector<8x896xf32>
    %36 = tpu.matmul %34, %35, %cst_23 {dimension_numbers = #tpu.dot_dimension_numbers<[1], [0], [0], [1], [0, 0, 1, 1], [], []>} : vector<8x512xbf16>, vector<512x896xbf16>, vector<8x896xf32> -> vector<8x896xf32>
    %c0_24 = arith.constant 0 : index
    %c0_25 = arith.constant 0 : index
    %37 = vector.load %arg9[%c0_24, %c0_25] : memref<1x896xf32, #tpu.memory_space<vmem>>, vector<1x896xf32>
    %38 = vector.broadcast %37 : vector<1x896xf32> to vector<8x896xf32>
    %39 = arith.addf %36, %38 : vector<8x896xf32>
    %40 = math.tanh %39 : vector<8x896xf32>
    %c0_26 = arith.constant 0 : index
    %c0_27 = arith.constant 0 : index
    %41 = vector.load %arg10[%c0_26, %c0_27] : memref<8x896xf32, #tpu.memory_space<vmem>>, vector<8x896xf32>
    tpu.vector_store %arg10[%c0_26, %c0_27], %40 {strides = array<i32>} : memref<8x896xf32, #tpu.memory_space<vmem>>, vector<8x896xf32>,
    return
  }
  func.func @transform_0(%arg0: i32) -> (i32, i32) {
    %c0_i32 = arith.constant 0 : i32
    %c0_i32_0 = arith.constant 0 : i32
    return %arg0, %c0_i32 : i32, i32
  }
  func.func @transform_1(%arg0: i32) -> (i32, i32) {
    %c0_i32 = arith.constant 0 : i32
    %c0_i32_0 = arith.constant 0 : i32
    %c0_i32_1 = arith.constant 0 : i32
    return %c0_i32, %c0_i32_0 : i32, i32
  }
  func.func @transform_2(%arg0: i32) -> (i32, i32) {
    %c0_i32 = arith.constant 0 : i32
    %c0_i32_0 = arith.constant 0 : i32
    %c0_i32_1 = arith.constant 0 : i32
    return %c0_i32, %c0_i32_0 : i32, i32
  }
  func.func @transform_3(%arg0: i32) -> (i32, i32) {
    %c0_i32 = arith.constant 0 : i32
    %c0_i32_0 = arith.constant 0 : i32
    %c0_i32_1 = arith.constant 0 : i32
    return %c0_i32, %c0_i32_0 : i32, i32
  }
  func.func @transform_4(%arg0: i32) -> (i32, i32) {
    %c0_i32 = arith.constant 0 : i32
    %c0_i32_0 = arith.constant 0 : i32
    %c0_i32_1 = arith.constant 0 : i32
    return %c0_i32, %c0_i32_0 : i32, i32
  }
  func.func @transform_5(%arg0: i32) -> (i32, i32) {
    %c0_i32 = arith.constant 0 : i32
    %c0_i32_0 = arith.constant 0 : i32
    %c0_i32_1 = arith.constant 0 : i32
    return %c0_i32, %c0_i32_0 : i32, i32
  }
  func.func @transform_6(%arg0: i32) -> (i32, i32) {
    %c0_i32 = arith.constant 0 : i32
    %c0_i32_0 = arith.constant 0 : i32
    %c0_i32_1 = arith.constant 0 : i32
    return %c0_i32, %c0_i32_0 : i32, i32
  }
  func.func @transform_7(%arg0: i32) -> (i32, i32) {
    %c0_i32 = arith.constant 0 : i32
    %c0_i32_0 = arith.constant 0 : i32
    %c0_i32_1 = arith.constant 0 : i32
    return %c0_i32, %c0_i32_0 : i32, i32
  }
  func.func @transform_8(%arg0: i32) -> (i32, i32) {
    %c0_i32 = arith.constant 0 : i32
    %c0_i32_0 = arith.constant 0 : i32
    %c0_i32_1 = arith.constant 0 : i32
    return %c0_i32, %c0_i32_0 : i32, i32
  }
  func.func @transform_9(%arg0: i32) -> (i32, i32) {
    %c0_i32 = arith.constant 0 : i32
    %c0_i32_0 = arith.constant 0 : i32
    return %arg0, %c0_i32 : i32, i32
  }
}

</mosaic_0001>

<bundles_post_ra>
// kernel: tpu_custom_call.1
= control target key start
LH: loop header
LB: loop body
LE: loop exit
PB: predicated region body
PF: predicated region fallthrough
CT: control target
= control target key end

     0   :  { %14 = vsyncpa [#allocation3], 0  ;;  %s3921_s0 = inlined_call_operand.hbm [shape: f32[8,128], index: 0, kind: input, shape index: {}]   ;;  %s3922_s1 = inlined_call_operand.hbm [shape: bf16[128,128], index: 1, kind: input, shape index: {}]   ;;  %s3923_s2 = inlined_call_operand.vmem [shape: f32[1,128], index: 2, kind: input, shape index: {}]   ;;  %s3924_s3 = inlined_call_operand.hbm [shape: bf16[128,256], index: 3, kind: input, shape index: {}]   ;;  %s3925_s4 = inlined_call_operand.vmem [shape: f32[1,256], index: 4, kind: input, shape index: {}]   ;;  %s3926_s5 = inlined_call_operand.hbm [shape: bf16[256,512], index: 5, kind: input, shape index: {}]   ;;  %s3927_s6 = inlined_call_operand.vmem [shape: f32[1,512], index: 6, kind: input, shape index: {}]   ;;  %s3928_s7 = inlined_call_operand.hbm [shape: bf16[512,896], index: 7, kind: input, shape index: {}]   ;;  %s3929_s8 = inlined_call_operand.vmem [shape: f32[1,896], index: 8, kind: input, shape index: {}]   ;;  %s3930_s9 = inlined_call_operand.hbm [shape: f32[8,896], index: 9, kind: output, shape index: {}]  }
   0x1   :  { %15 = vsyncpa [#allocation6], 0 }
   0x2   :  { %16 = vsyncpa [#allocation9], 0 }
   0x3   :  { %17 = vsyncpa [#allocation4], 0  ;;  %s3703_s30 = smov [#allocation5]   ;;  %s3563_s13 = scalar_lea.hbm %s3922_s1, 1024 }
   0x4   :  { %s33_s10 = sshll.u32 %s3703_s30, 4  ;;  %p3564_p0 = scmp.ne.s32.totalorder %s3922_s1, %s3563_s13  ;;  %s34_s10 = int_to_ptr.vmem [resolvable:$true] %s33_s10 }
   0x5   :  { %p3567_p1 = scmp.lt.u32.totalorder %s3563_s13, %s3922_s1 }
   0x7   :  { %p3569_p2 = pnand %p3567_p1, %p3564_p0 }
   0x9   :  { %3572 = shalt.err (!%p3569_p2)
}
   0xa   :  { %s3573_s18 = scalar_lea.vmem %s34_s10, 1024  ;;  %p3578_p4 = scmp.lt.s32.totalorder %s34_s10, %s34_s10 }
   0xb   :  { %p3574_p3 = scmp.ne.s32.totalorder %s34_s10, %s3573_s18  ;;  %p3579_p5 = scmp.lt.s32.totalorder %s3573_s18, %s3573_s18 }
   0xd   :  { %p3580_p6 = por %p3579_p5, %p3578_p4 }
   0xf   :  { %p3581_p7 = pnand %p3580_p6, %p3574_p3 }
  0x11   :  { %3584 = shalt.err (!%p3581_p7)
}
  0x12   :  { %s3704_s19 = smov 64   ;;  %s3705_s20 = smov 4  }
  0x13   :  { %39 = dma.hbm_to_vmem [thread:$0]  %s3922_s1, 1024, %s34_s10, [#allocation6], %s3704_s19, %s3704_s19, %s3705_s20  }
  0x14   :  { %s3706_s23 = smov [#allocation8]   ;;  %s3585_s27 = scalar_lea.hbm %s3926_s5, 8192 }
  0x15   :  { %s61_s24 = sshll.u32 %s3706_s23, 4  ;;  %p3586_p8 = scmp.ne.s32.totalorder %s3926_s5, %s3585_s27  ;;  %s62_s24 = int_to_ptr.vmem [resolvable:$true] %s61_s24 }
  0x16   :  { %p3589_p9 = scmp.lt.u32.totalorder %s3585_s27, %s3926_s5 }
  0x18   :  { %p3591_p10 = pnand %p3589_p9, %p3586_p8 }
  0x1a   :  { %3594 = shalt.err (!%p3591_p10)
}
  0x1b   :  { %s3595_s12 = scalar_lea.vmem %s62_s24, 8192  ;;  %p3600_p12 = scmp.lt.s32.totalorder %s62_s24, %s62_s24 }
  0x1c   :  { %p3596_p11 = scmp.ne.s32.totalorder %s62_s24, %s3595_s12  ;;  %p3601_p13 = scmp.lt.s32.totalorder %s3595_s12, %s3595_s12 }
  0x1e   :  { %p3602_p0 = por %p3601_p13, %p3600_p12 }
  0x20   :  { %p3603_p1 = pnand %p3602_p0, %p3596_p11 }
  0x22   :  { %3606 = shalt.err (!%p3603_p1)
}
  0x23   :  { %s3707_s1 = smov 256   ;;  %s3708_s10 = smov 16  }
  0x24   :  { %67 = dma.hbm_to_vmem [thread:$0]  %s3926_s5, 8192, %s62_s24, [#allocation9], %s3707_s1, %s3707_s1, %s3708_s10  }
  0x25   :  { %s3709_s15 = smov [#allocation2]   ;;  %s3710_s17 = smov [#allocation7]  }
  0x26   :  { %s24_s16 = sshll.u32 %s3709_s15, 4  ;;  %s47_s18 = sshll.u32 %s3710_s17, 4  ;;  %s25_s16 = int_to_ptr.vmem [resolvable:$true] %s24_s16  ;;  %s3794_s18 = int_to_ptr.vmem [resolvable:$true] %s47_s18 }
  0x27   :  { %s3607_s21 = scalar_lea.hbm %s3921_s0, 128 }
  0x28   :  { %p3608_p2 = scmp.ne.s32.totalorder %s3921_s0, %s3607_s21  ;;  %p3611_p3 = scmp.lt.u32.totalorder %s3607_s21, %s3921_s0 }
  0x2a   :  { %p3613_p4 = pnand %p3611_p3, %p3608_p2 }
  0x2c   :  { %3616 = shalt.err (!%p3613_p4)
}
  0x2d   :  { %s3617_s5 = scalar_lea.vmem %s25_s16, 128  ;;  %p3622_p6 = scmp.lt.s32.totalorder %s25_s16, %s25_s16 }
  0x2e   :  { %p3618_p5 = scmp.ne.s32.totalorder %s25_s16, %s3617_s5  ;;  %p3623_p7 = scmp.lt.s32.totalorder %s3617_s5, %s3617_s5 }
  0x30   :  { %p3624_p8 = por %p3623_p7, %p3622_p6 }
  0x32   :  { %p3625_p9 = pnand %p3624_p8, %p3618_p5 }
  0x34   :  { %3628 = shalt.err (!%p3625_p9)
}
  0x35   :  { %27 = dma.hbm_to_vmem [thread:$0]  %s3921_s0, 128, %s25_s16, [#allocation3]  }
  0x36   :  { %s3629_s30 = scalar_lea.hbm %s3924_s3, 2048 }
  0x37   :  { %p3630_p10 = scmp.ne.s32.totalorder %s3924_s3, %s3629_s30  ;;  %p3633_p11 = scmp.lt.u32.totalorder %s3629_s30, %s3924_s3 }
  0x39   :  { %p3635_p12 = pnand %p3633_p11, %p3630_p10 }
  0x3b   :  { %3638 = shalt.err (!%p3635_p12)
}
  0x3c   :  { %s3639_s13 = scalar_lea.vmem %s3794_s18, 2048  ;;  %p3644_p0 = scmp.lt.s32.totalorder %s3794_s18, %s3794_s18 }
  0x3d   :  { %p3640_p13 = scmp.ne.s32.totalorder %s3794_s18, %s3639_s13  ;;  %p3645_p1 = scmp.lt.s32.totalorder %s3639_s13, %s3639_s13 }
  0x3f   :  { %p3646_p2 = por %p3645_p1, %p3644_p0 }
  0x41   :  { %p3647_p3 = pnand %p3646_p2, %p3640_p13 }
  0x43   :  { %3650 = shalt.err (!%p3647_p3)
}
  0x44   :  { %s3711_s0 = smov 128   ;;  %s3712_s14 = smov 8  }
  0x45   :  { %53 = dma.hbm_to_vmem [thread:$0]  %s3924_s3, 2048, %s3794_s18, [#allocation6], %s3711_s0, %s3711_s0, %s3712_s14  }
  0x46   :  { %s3713_s17 = smov [#allocation10]   ;;  %s3651_s22 = scalar_lea.hbm %s3928_s7, 28672 }
  0x47   :  { %s75_s19 = sshll.u32 %s3713_s17, 4  ;;  %p3652_p4 = scmp.ne.s32.totalorder %s3928_s7, %s3651_s22  ;;  %s76_s19 = int_to_ptr.vmem [resolvable:$true] %s75_s19 }
  0x48   :  { %p3655_p5 = scmp.lt.u32.totalorder %s3651_s22, %s3928_s7 }
  0x4a   :  { %p3657_p6 = pnand %p3655_p5, %p3652_p4 }
  0x4c   :  { %3660 = shalt.err (!%p3657_p6)
}
  0x4d   :  { %s3661_s24 = scalar_lea.vmem %s76_s19, 28672  ;;  %p3666_p8 = scmp.lt.s32.totalorder %s76_s19, %s76_s19 }
  0x4e   :  { %p3662_p7 = scmp.ne.s32.totalorder %s76_s19, %s3661_s24  ;;  %p3667_p9 = scmp.lt.s32.totalorder %s3661_s24, %s3661_s24 }
  0x50   :  { %p3668_p10 = por %p3667_p9, %p3666_p8 }
  0x52   :  { %p3669_p11 = pnand %p3668_p10, %p3662_p7 }
  0x54   :  { %3672 = shalt.err (!%p3669_p11)
}
  0x55   :  { %s3714_s3 = smov 448   ;;  %s3715_s18 = smov 28  }
  0x56   :  { %81 = dma.hbm_to_vmem [thread:$0]  %s3928_s7, 28672, %s76_s19, [#allocation9], %s3714_s3, %s3714_s3, %s3715_s18  }
  0x57   :  { %3695 = dma.done.wait [#allocation3], 128  }
  0x58   :  { %3696 = vsyncadd [#allocation3], 4294967168 }
  0x59   :  { %3697 = dma.done.wait [#allocation6], 3072  }
  0x5a   :  { %3698 = vsyncadd [#allocation6], 4294964224 }
  0x5b   :  { %3699 = dma.done.wait [#allocation9], 36864  }
  0x5c   :  { %3700 = vsyncadd [#allocation9], 4294930432  ;;  %v3716_v0 = vmov 0.0   ;;  %vm3717_vm0 = vmmov 0   ;;  %v3101_v1 = vld [vmem:[#allocation5] sm:$0xff]   ;;  %v3102_v2 = vld [vmem:[#allocation5 + $0x8] sm:$0xff]  }
  0x5d   :  { %3046 = vmatprep.subr.bf16.mxu1 %v3716_v0  ;;  %3062 = vmatprep.mubr.msk.bf16.mxu1 %vm3717_vm0, %v3716_v0  ;;  %v3103_v3 = vld [vmem:[#allocation5 + $0x10] sm:$0xff]   ;;  %v3104_v4 = vld [vmem:[#allocation5 + $0x18] sm:$0xff]   ;;  %v3105_v5 = vld [vmem:[#allocation5 + $0x20] sm:$0xff]   ;;  %v3718_v27 = vmov 0  }
  0x5e   :  { %3047 = vmatpush3.bf16.msra.mxu1 %v3101_v1  ;;  %v3106_v6 = vld [vmem:[#allocation5 + $0x28] sm:$0xff]   ;;  %v3107_v7 = vld [vmem:[#allocation5 + $0x30] sm:$0xff]   ;;  %v3108_v8 = vld [vmem:[#allocation5 + $0x38] sm:$0xff]  }
  0x5f   :  { %3048 = vmatprep.subr.bf16.mxu1 %v3716_v0  ;;  %v100_v9 = vld [vmem:[#allocation2] sm:$0xff]  ;;  %v3111_v10 = vld [vmem:[#allocation7 + $0x4] ss:$8 sps:$4 sm:$0xff]   ;;  %v3109_v11 = vld [vmem:[#allocation7] ss:$8 sps:$4 sm:$0xff]  }
  0x60   :  { %v101_v12 = vpack.c.bf16 %v100_v9, %v100_v9  ;;  %v3114_v13 = vld [vmem:[#allocation7 + $0x14] ss:$8 sps:$4 sm:$0xff]   ;;  %v3112_v14 = vld [vmem:[#allocation7 + $0x10] ss:$8 sps:$4 sm:$0xff]   ;;  %v3117_v15 = vld [vmem:[#allocation7 + $0x24] ss:$8 sps:$4 sm:$0xff]  }
  0x61   :  { %v3115_v16 = vld [vmem:[#allocation7 + $0x20] ss:$8 sps:$4 sm:$0xff]   ;;  %v3120_v17 = vld [vmem:[#allocation7 + $0x34] ss:$8 sps:$4 sm:$0xff]   ;;  %v3118_v18 = vld [vmem:[#allocation7 + $0x30] ss:$8 sps:$4 sm:$0xff]  }
  0x62   :  { %3049 = vmatpush3.bf16.msra.mxu1 %v3102_v2  ;;  %v3123_v19 = vld [vmem:[#allocation7 + $0x44] ss:$8 sps:$4 sm:$0xff]   ;;  %v3121_v20 = vld [vmem:[#allocation7 + $0x40] ss:$8 sps:$4 sm:$0xff]   ;;  %v3126_v21 = vld [vmem:[#allocation7 + $0x54] ss:$8 sps:$4 sm:$0xff]  }
  0x63   :  { %3050 = vmatprep.subr.bf16.mxu1 %v3716_v0  ;;  %v3124_v22 = vld [vmem:[#allocation7 + $0x50] ss:$8 sps:$4 sm:$0xff]   ;;  %v3129_v23 = vld [vmem:[#allocation7 + $0x64] ss:$8 sps:$4 sm:$0xff]   ;;  %v3127_v24 = vld [vmem:[#allocation7 + $0x60] ss:$8 sps:$4 sm:$0xff]  }
  0x64   :  { %v3132_v25 = vld [vmem:[#allocation7 + $0x74] ss:$8 sps:$4 sm:$0xff]   ;;  %v3130_v26 = vld [vmem:[#allocation7 + $0x70] ss:$8 sps:$4 sm:$0xff]  }
  0x65   :  { %v3133_v28 = vld [vmem:[#allocation8 + $0x4] ss:$16 sps:$4 sm:$0xff]   ;;  %v3137_v29 = vld [vmem:[#allocation8 + $0xc] ss:$16 sps:$4 sm:$0xff]   ;;  %v3138_v30 = vld [vmem:[#allocation8] ss:$16 sps:$4 sm:$0xff]  }
  0x66   :  { %3051 = vmatpush3.bf16.msra.mxu1 %v3103_v3  ;;  %v3139_v31 = vld [vmem:[#allocation8 + $0x24] ss:$16 sps:$4 sm:$0xff]   ;;  %780 = vmatprep.subr.bf16.mxu0 %v3133_v28  ;;  %v3144_v32 = vld [vmem:[#allocation8 + $0x20] ss:$16 sps:$4 sm:$0xff]   ;;  %v2680_v57 = vld [vmem:[%s3923_s2] ss:$0 sm:$0xff] }
  0x67   :  { %3052 = vmatprep.subr.bf16.mxu1 %v3716_v0  ;;  %781 = vmatpush1.bf16.msra.mxu0 %v3138_v30  ;;  %v3145_v33 = vld [vmem:[#allocation8 + $0x44] ss:$16 sps:$4 sm:$0xff]   ;;  %v3150_v34 = vld [vmem:[#allocation8 + $0x40] ss:$16 sps:$4 sm:$0xff]   ;;  %v3135_v1 = vld [vmem:[#allocation8 + $0x8] ss:$16 sps:$4 sm:$0xff]  }
  0x68   :  { %782 = vmatprep.subr.bf16.mxu0 %v3139_v31  ;;  %v3151_v35 = vld [vmem:[#allocation8 + $0x64] ss:$16 sps:$4 sm:$0xff]   ;;  %v3156_v36 = vld [vmem:[#allocation8 + $0x60] ss:$16 sps:$4 sm:$0xff]   ;;  %v3143_v3 = vld [vmem:[#allocation8 + $0x2c] ss:$16 sps:$4 sm:$0xff]  }
  0x69   :  { %v3157_v37 = vld [vmem:[#allocation8 + $0x84] ss:$16 sps:$4 sm:$0xff]   ;;  %v3162_v38 = vld [vmem:[#allocation8 + $0x80] ss:$16 sps:$4 sm:$0xff]   ;;  %v3161_v9 = vld [vmem:[#allocation8 + $0x8c] ss:$16 sps:$4 sm:$0xff]  }
  0x6a   :  { %3053 = vmatpush3.bf16.msra.mxu1 %v3104_v4  ;;  %v3163_v39 = vld [vmem:[#allocation8 + $0xa4] ss:$16 sps:$4 sm:$0xff]   ;;  %v3168_v40 = vld [vmem:[#allocation8 + $0xa0] ss:$16 sps:$4 sm:$0xff]   ;;  %v3141_v4 = vld [vmem:[#allocation8 + $0x28] ss:$16 sps:$4 sm:$0xff]  }
  0x6b   :  { %3054 = vmatprep.subr.bf16.mxu1 %v3716_v0  ;;  %783 = vmatpush1.bf16.msra.mxu0 %v3144_v32  ;;  %v3169_v41 = vld [vmem:[#allocation8 + $0xc4] ss:$16 sps:$4 sm:$0xff]   ;;  %v3174_v42 = vld [vmem:[#allocation8 + $0xc0] ss:$16 sps:$4 sm:$0xff]   ;;  %v3213_v28 = vld [vmem:[#allocation8 + $0x1a8] ss:$16 sps:$4 sm:$0xff]  }
  0x6c   :  { %784 = vmatprep.subr.bf16.mxu0 %v3145_v33  ;;  %v3175_v43 = vld [vmem:[#allocation8 + $0xe4] ss:$16 sps:$4 sm:$0xff]   ;;  %v3180_v44 = vld [vmem:[#allocation8 + $0xe0] ss:$16 sps:$4 sm:$0xff]   ;;  %v3221_v30 = vld [vmem:[#allocation8 + $0x1cc] ss:$16 sps:$4 sm:$0xff]  }
  0x6d   :  { %v3181_v45 = vld [vmem:[#allocation8 + $0x104] ss:$16 sps:$4 sm:$0xff]   ;;  %v3186_v46 = vld [vmem:[#allocation8 + $0x100] ss:$16 sps:$4 sm:$0xff]   ;;  %v3219_v31 = vld [vmem:[#allocation8 + $0x1c8] ss:$16 sps:$4 sm:$0xff]  }
  0x6e   :  { %3055 = vmatpush3.bf16.msra.mxu1 %v3105_v5  ;;  %v3187_v47 = vld [vmem:[#allocation8 + $0x124] ss:$16 sps:$4 sm:$0xff]   ;;  %v3192_v48 = vld [vmem:[#allocation8 + $0x120] ss:$16 sps:$4 sm:$0xff]   ;;  %v3149_v5 = vld [vmem:[#allocation8 + $0x4c] ss:$16 sps:$4 sm:$0xff]  }
  0x6f   :  { %3056 = vmatprep.subr.bf16.mxu1 %v3716_v0  ;;  %785 = vmatpush1.bf16.msra.mxu0 %v3150_v34  ;;  %v3193_v49 = vld [vmem:[#allocation8 + $0x144] ss:$16 sps:$4 sm:$0xff]   ;;  %v3198_v50 = vld [vmem:[#allocation8 + $0x140] ss:$16 sps:$4 sm:$0xff]   ;;  %v3225_v34 = vld [vmem:[#allocation8 + $0x1e8] ss:$16 sps:$4 sm:$0xff]  }
  0x70   :  { %786 = vmatprep.subr.bf16.mxu0 %v3151_v35  ;;  %v3199_v51 = vld [vmem:[#allocation8 + $0x164] ss:$16 sps:$4 sm:$0xff]   ;;  %v3204_v52 = vld [vmem:[#allocation8 + $0x160] ss:$16 sps:$4 sm:$0xff]   ;;  %v3227_v35 = vld [vmem:[#allocation8 + $0x1ec] ss:$16 sps:$4 sm:$0xff]  }
  0x71   :  { %v3205_v53 = vld [vmem:[#allocation8 + $0x184] ss:$16 sps:$4 sm:$0xff]   ;;  %v3210_v54 = vld [vmem:[#allocation8 + $0x180] ss:$16 sps:$4 sm:$0xff]  }
  0x72   :  { %3057 = vmatpush3.bf16.msra.mxu1 %v3106_v6  ;;  %v3211_v55 = vld [vmem:[#allocation8 + $0x1a4] ss:$16 sps:$4 sm:$0xff]   ;;  %v3216_v56 = vld [vmem:[#allocation8 + $0x1a0] ss:$16 sps:$4 sm:$0xff]   ;;  %v3147_v6 = vld [vmem:[#allocation8 + $0x48] ss:$16 sps:$4 sm:$0xff]  }
  0x73   :  { %3058 = vmatprep.subr.bf16.mxu1 %v3716_v0  ;;  %787 = vmatpush1.bf16.msra.mxu0 %v3156_v36  ;;  %v3222_v32 = vld [vmem:[#allocation8 + $0x1c0] ss:$16 sps:$4 sm:$0xff]   ;;  %v3223_v33 = vld [vmem:[#allocation8 + $0x1e4] ss:$16 sps:$4 sm:$0xff]  }
  0x74   :  { %788 = vmatprep.subr.bf16.mxu0 %v3157_v37  ;;  %v3228_v36 = vld [vmem:[#allocation8 + $0x1e0] ss:$16 sps:$4 sm:$0xff]  }
  0x75   :  { %v3231_v37 = vld [vmem:[#allocation10 + $0x4] ss:$28 sps:$4 sm:$0xff]  }
  0x76   :  { %3059 = vmatpush3.bf16.msra.mxu1 %v3107_v7  ;;  %v3155_v7 = vld [vmem:[#allocation8 + $0x6c] ss:$16 sps:$4 sm:$0xff]  }
  0x77   :  { %3060 = vmatprep.subr.bf16.mxu1 %v3716_v0  ;;  %789 = vmatpush1.bf16.msra.mxu0 %v3162_v38  ;;  %v3234_v38 = vld [vmem:[#allocation10 + $0xc] ss:$28 sps:$4 sm:$0xff]  }
  0x78   :  { %790 = vmatprep.subr.bf16.mxu0 %v3163_v39  ;;  %v235_v39 = vlaneseq }
  0x7a   :  { %3061 = vmatpush3.bf16.msra.mxu1 %v3108_v8  ;;  %v3153_v8 = vld [vmem:[#allocation8 + $0x68] ss:$16 sps:$4 sm:$0xff]  }
  0x7b   :  { %325 = vmatprep.subr.bf16.mxu1 %v3111_v10  ;;  %791 = vmatpush1.bf16.msra.mxu0 %v3168_v40  ;;  %v3159_v10 = vld [vmem:[#allocation8 + $0x88] ss:$16 sps:$4 sm:$0xff]   ;;  %v3840_v40 = vshrl.u32 %v235_v39, 7  ;;  %v3298_v39 = vld [vmem:[#allocation10 + $0x270] ss:$28 sps:$4 sm:$0xff]  }
  0x7c   :  { %792 = vmatprep.subr.bf16.mxu0 %v3169_v41 }
  0x7d   :  { %3063 = vmatmul.mubr.bf16.vlgmr.msra.gmra.mrb[0].mxu1 %v101_v12  ;;  %v3165_v12 = vld [vmem:[#allocation8 + $0xa8] ss:$16 sps:$4 sm:$0xff]   ;;  %v3843_v41 = vsub.s32 0, %v3840_v40 }
  0x7e   :  { %326 = vmatpush1.bf16.msra.mxu1 %v3109_v11  ;;  %357 = vmatprep.mubr.bf16.mxu1 %v3718_v27  ;;  %v3167_v11 = vld [vmem:[#allocation8 + $0xac] ss:$16 sps:$4 sm:$0xff]  }
  0x7f   :  { %327 = vmatprep.subr.bf16.mxu1 %v3114_v13  ;;  %793 = vmatpush1.bf16.msra.mxu0 %v3174_v42  ;;  %v3173_v13 = vld [vmem:[#allocation8 + $0xcc] ss:$16 sps:$4 sm:$0xff]   ;;  %v233_v42 = vld [vmem:[%s3925_s4] sm:$0x3] }
  0x80   :  { %794 = vmatprep.subr.bf16.mxu0 %v3175_v43  ;;  %v3215_v27 = vld [vmem:[#allocation8 + $0x1ac] ss:$16 sps:$4 sm:$0xff]   ;;  %v3849_v43 = vsub.s32 1, %v3840_v40 }
  0x82   :  { %328 = vmatpush1.bf16.msra.mxu1 %v3112_v14  ;;  %v3171_v14 = vld [vmem:[#allocation8 + $0xc8] ss:$16 sps:$4 sm:$0xff]  }
  0x83   :  { %329 = vmatprep.subr.bf16.mxu1 %v3117_v15  ;;  %795 = vmatpush1.bf16.msra.mxu0 %v3180_v44  ;;  %v3179_v15 = vld [vmem:[#allocation8 + $0xec] ss:$16 sps:$4 sm:$0xff]   ;;  %v238_v44 = vrot.slane %v233_v42, %v3843_v41 }
  0x84   :  { %796 = vmatprep.subr.bf16.mxu0 %v3181_v45  ;;  %v242_v45 = vrot.slane %v233_v42, %v3849_v43  ;;  %v3303_v42 = vld [vmem:[#allocation10 + $0x2a4] ss:$28 sps:$4 sm:$0xff]  }
  0x86   :  { %330 = vmatpush1.bf16.msra.mxu1 %v3115_v16  ;;  %v3177_v16 = vld [vmem:[#allocation8 + $0xe8] ss:$16 sps:$4 sm:$0xff]  }
  0x87   :  { %331 = vmatprep.subr.bf16.mxu1 %v3120_v17  ;;  %797 = vmatpush1.bf16.msra.mxu0 %v3186_v46  ;;  %v3185_v17 = vld [vmem:[#allocation8 + $0x10c] ss:$16 sps:$4 sm:$0xff]  }
  0x88   :  { %798 = vmatprep.subr.bf16.mxu0 %v3187_v47 }
  0x8a   :  { %332 = vmatpush1.bf16.msra.mxu1 %v3118_v18  ;;  %v3183_v18 = vld [vmem:[#allocation8 + $0x108] ss:$16 sps:$4 sm:$0xff]  }
  0x8b   :  { %333 = vmatprep.subr.bf16.mxu1 %v3123_v19  ;;  %799 = vmatpush1.bf16.msra.mxu0 %v3192_v48  ;;  %v3191_v19 = vld [vmem:[#allocation8 + $0x12c] ss:$16 sps:$4 sm:$0xff]  }
  0x8c   :  { %800 = vmatprep.subr.bf16.mxu0 %v3193_v49 }
  0x8e   :  { %334 = vmatpush1.bf16.msra.mxu1 %v3121_v20  ;;  %v3189_v20 = vld [vmem:[#allocation8 + $0x128] ss:$16 sps:$4 sm:$0xff]  }
  0x8f   :  { %335 = vmatprep.subr.bf16.mxu1 %v3126_v21  ;;  %801 = vmatpush1.bf16.msra.mxu0 %v3198_v50  ;;  %v3197_v21 = vld [vmem:[#allocation8 + $0x14c] ss:$16 sps:$4 sm:$0xff]  }
  0x90   :  { %802 = vmatprep.subr.bf16.mxu0 %v3199_v51 }
  0x92   :  { %336 = vmatpush1.bf16.msra.mxu1 %v3124_v22  ;;  %v3195_v22 = vld [vmem:[#allocation8 + $0x148] ss:$16 sps:$4 sm:$0xff]  }
  0x93   :  { %337 = vmatprep.subr.bf16.mxu1 %v3129_v23  ;;  %803 = vmatpush1.bf16.msra.mxu0 %v3204_v52  ;;  %v3203_v23 = vld [vmem:[#allocation8 + $0x16c] ss:$16 sps:$4 sm:$0xff]  }
  0x94   :  { %804 = vmatprep.subr.bf16.mxu0 %v3205_v53 }
  0x96   :  { %338 = vmatpush1.bf16.msra.mxu1 %v3127_v24  ;;  %v3201_v24 = vld [vmem:[#allocation8 + $0x168] ss:$16 sps:$4 sm:$0xff]  }
  0x97   :  { %339 = vmatprep.subr.bf16.mxu1 %v3132_v25  ;;  %805 = vmatpush1.bf16.msra.mxu0 %v3210_v54  ;;  %v3209_v25 = vld [vmem:[#allocation8 + $0x18c] ss:$16 sps:$4 sm:$0xff]  }
  0x98   :  { %806 = vmatprep.subr.bf16.mxu0 %v3211_v55 }
  0x9a   :  { %340 = vmatpush1.bf16.msra.mxu1 %v3130_v26  ;;  %v3207_v26 = vld [vmem:[#allocation8 + $0x188] ss:$16 sps:$4 sm:$0xff]  }
  0x9b   :  { %821 = vmatprep.subr.bf16.mxu1 %v3137_v29  ;;  %807 = vmatpush1.bf16.msra.mxu0 %v3216_v56  ;;  %v3217_v29 = vld [vmem:[#allocation8 + $0x1c4] ss:$16 sps:$4 sm:$0xff]  }
  0x9c   :  { %808 = vmatprep.subr.bf16.mxu0 %v3217_v29  ;;  %v3288_v29 = vld [vmem:[#allocation10 + $0x204] ss:$28 sps:$4 sm:$0xff]  }
  0x9f   :  { %809 = vmatpush1.bf16.msra.mxu0 %v3222_v32  ;;  %v3291_v32 = vld [vmem:[#allocation10 + $0x234] ss:$28 sps:$4 sm:$0xff]  }
  0xa0   :  { %810 = vmatprep.subr.bf16.mxu0 %v3223_v33  ;;  %v3294_v33 = vld [vmem:[#allocation10 + $0x23c] ss:$28 sps:$4 sm:$0xff]  }
  0xa3   :  { %811 = vmatpush1.bf16.msra.mxu0 %v3228_v36  ;;  %v3297_v36 = vld [vmem:[#allocation10 + $0x26c] ss:$28 sps:$4 sm:$0xff]  }
  0xa4   :  { %2323 = vmatprep.subr.bf16.mxu0 %v3231_v37  ;;  %v3300_v37 = vld [vmem:[#allocation10 + $0x274] ss:$28 sps:$4 sm:$0xff]  }
 0x150   :  { %v207_v58 = vpop.f32.mrb[0].mxu1 }
 0x151   :  { %v208_v59 = vadd.f32 %v2680_v57, %v207_v58  ;;  %v3064_v60 = vpop.f32.mrb[1].mxu1  ;;  %v3229_v57 = vld [vmem:[#allocation10] ss:$28 sps:$4 sm:$0xff]   ;;  %v3232_v58 = vld [vmem:[#allocation10 + $0x8] ss:$28 sps:$4 sm:$0xff]  }
 0x152   :  { %v210_v61 = vpop.f32.mrb[2].mxu1  ;;  %v3237_v60 = vld [vmem:[#allocation10 + $0x3c] ss:$28 sps:$4 sm:$0xff]  }
 0x153   :  { %vm213_vm1 = vcmp.gt.f32.partialorder %v208_v59, 0.0  ;;  %v214_v62 = vmul.f32 0.001, %v208_v59  ;;  %v3065_v63 = vpop.f32.mrb[3].mxu1  ;;  %v3240_v61 = vld [vmem:[#allocation10 + $0x44] ss:$28 sps:$4 sm:$0xff]  }
 0x154   :  { %v3238_v63 = vld [vmem:[#allocation10 + $0x40] ss:$28 sps:$4 sm:$0xff]  }
 0x155   :  { %v215_v0 = vsel %vm213_vm1, %v208_v59, %v214_v62  ;;  %v3235_v62 = vld [vmem:[#allocation10 + $0x38] ss:$28 sps:$4 sm:$0xff]  }
 0x156   :  { %v216_v2 = vpack.c.bf16 %v215_v0, %v215_v0  ;;  %v3243_v0 = vld [vmem:[#allocation10 + $0x74] ss:$28 sps:$4 sm:$0xff]  }
 0x158   :  { %358 = vmatmul.mubr.bf16.vlgmr.msra.gmra.mrb[4].mxu1 %v216_v2  ;;  %v3241_v2 = vld [vmem:[#allocation10 + $0x70] ss:$28 sps:$4 sm:$0xff]  }
 0x159   :  { %822 = vmatpush1.bf16.msra.mxu1 %v3135_v1  ;;  %v3246_v1 = vld [vmem:[#allocation10 + $0x7c] ss:$28 sps:$4 sm:$0xff]  }
 0x15a   :  { %823 = vmatprep.subr.bf16.mxu1 %v3143_v3  ;;  %v3244_v3 = vld [vmem:[#allocation10 + $0x78] ss:$28 sps:$4 sm:$0xff]  }
 0x15d   :  { %824 = vmatpush1.bf16.msra.mxu1 %v3141_v4  ;;  %v3249_v4 = vld [vmem:[#allocation10 + $0xac] ss:$28 sps:$4 sm:$0xff]  }
 0x15e   :  { %825 = vmatprep.subr.bf16.mxu1 %v3149_v5  ;;  %v3252_v5 = vld [vmem:[#allocation10 + $0xb4] ss:$28 sps:$4 sm:$0xff]  }
 0x161   :  { %826 = vmatpush1.bf16.msra.mxu1 %v3147_v6  ;;  %v3247_v6 = vld [vmem:[#allocation10 + $0xa8] ss:$28 sps:$4 sm:$0xff]  }
 0x162   :  { %827 = vmatprep.subr.bf16.mxu1 %v3155_v7  ;;  %v3250_v7 = vld [vmem:[#allocation10 + $0xb0] ss:$28 sps:$4 sm:$0xff]  }
 0x165   :  { %828 = vmatpush1.bf16.msra.mxu1 %v3153_v8  ;;  %v3255_v8 = vld [vmem:[#allocation10 + $0xe4] ss:$28 sps:$4 sm:$0xff]  }
 0x166   :  { %829 = vmatprep.subr.bf16.mxu1 %v3161_v9  ;;  %v3258_v9 = vld [vmem:[#allocation10 + $0xec] ss:$28 sps:$4 sm:$0xff]  }
 0x169   :  { %830 = vmatpush1.bf16.msra.mxu1 %v3159_v10  ;;  %v3253_v10 = vld [vmem:[#allocation10 + $0xe0] ss:$28 sps:$4 sm:$0xff]  }
 0x16a   :  { %831 = vmatprep.subr.bf16.mxu1 %v3167_v11  ;;  %v3256_v11 = vld [vmem:[#allocation10 + $0xe8] ss:$28 sps:$4 sm:$0xff]  }
 0x16d   :  { %832 = vmatpush1.bf16.msra.mxu1 %v3165_v12  ;;  %v3261_v12 = vld [vmem:[#allocation10 + $0x11c] ss:$28 sps:$4 sm:$0xff]  }
 0x16e   :  { %833 = vmatprep.subr.bf16.mxu1 %v3173_v13  ;;  %v3264_v13 = vld [vmem:[#allocation10 + $0x124] ss:$28 sps:$4 sm:$0xff]  }
 0x171   :  { %834 = vmatpush1.bf16.msra.mxu1 %v3171_v14  ;;  %v3259_v14 = vld [vmem:[#allocation10 + $0x118] ss:$28 sps:$4 sm:$0xff]  }
 0x172   :  { %835 = vmatprep.subr.bf16.mxu1 %v3179_v15  ;;  %v3262_v15 = vld [vmem:[#allocation10 + $0x120] ss:$28 sps:$4 sm:$0xff]  }
 0x175   :  { %836 = vmatpush1.bf16.msra.mxu1 %v3177_v16  ;;  %v3267_v16 = vld [vmem:[#allocation10 + $0x154] ss:$28 sps:$4 sm:$0xff]  }
 0x176   :  { %837 = vmatprep.subr.bf16.mxu1 %v3185_v17  ;;  %v3270_v17 = vld [vmem:[#allocation10 + $0x15c] ss:$28 sps:$4 sm:$0xff]  }
 0x179   :  { %838 = vmatpush1.bf16.msra.mxu1 %v3183_v18  ;;  %v3265_v18 = vld [vmem:[#allocation10 + $0x150] ss:$28 sps:$4 sm:$0xff]  }
 0x17a   :  { %839 = vmatprep.subr.bf16.mxu1 %v3191_v19  ;;  %v3268_v19 = vld [vmem:[#allocation10 + $0x158] ss:$28 sps:$4 sm:$0xff]  }
 0x17d   :  { %840 = vmatpush1.bf16.msra.mxu1 %v3189_v20  ;;  %v3273_v20 = vld [vmem:[#allocation10 + $0x18c] ss:$28 sps:$4 sm:$0xff]  }
 0x17e   :  { %841 = vmatprep.subr.bf16.mxu1 %v3197_v21  ;;  %v3276_v21 = vld [vmem:[#allocation10 + $0x194] ss:$28 sps:$4 sm:$0xff]  }
 0x181   :  { %842 = vmatpush1.bf16.msra.mxu1 %v3195_v22  ;;  %v3271_v22 = vld [vmem:[#allocation10 + $0x188] ss:$28 sps:$4 sm:$0xff]  }
 0x182   :  { %843 = vmatprep.subr.bf16.mxu1 %v3203_v23  ;;  %v3274_v23 = vld [vmem:[#allocation10 + $0x190] ss:$28 sps:$4 sm:$0xff]  }
 0x185   :  { %844 = vmatpush1.bf16.msra.mxu1 %v3201_v24  ;;  %v3279_v24 = vld [vmem:[#allocation10 + $0x1c4] ss:$28 sps:$4 sm:$0xff]  }
 0x186   :  { %845 = vmatprep.subr.bf16.mxu1 %v3209_v25  ;;  %v3282_v25 = vld [vmem:[#allocation10 + $0x1cc] ss:$28 sps:$4 sm:$0xff]  }
 0x189   :  { %846 = vmatpush1.bf16.msra.mxu1 %v3207_v26  ;;  %v3277_v26 = vld [vmem:[#allocation10 + $0x1c0] ss:$28 sps:$4 sm:$0xff]  }
 0x18a   :  { %847 = vmatprep.subr.bf16.mxu1 %v3215_v27  ;;  %v3280_v27 = vld [vmem:[#allocation10 + $0x1c8] ss:$28 sps:$4 sm:$0xff]  }
 0x18d   :  { %848 = vmatpush1.bf16.msra.mxu1 %v3213_v28  ;;  %v3285_v28 = vld [vmem:[#allocation10 + $0x1fc] ss:$28 sps:$4 sm:$0xff]  }
 0x18e   :  { %849 = vmatprep.subr.bf16.mxu1 %v3221_v30  ;;  %v3283_v30 = vld [vmem:[#allocation10 + $0x1f8] ss:$28 sps:$4 sm:$0xff]  }
 0x191   :  { %850 = vmatpush1.bf16.msra.mxu1 %v3219_v31  ;;  %v3286_v31 = vld [vmem:[#allocation10 + $0x200] ss:$28 sps:$4 sm:$0xff]  }
 0x192   :  { %851 = vmatprep.subr.bf16.mxu1 %v3227_v35  ;;  %v3292_v35 = vld [vmem:[#allocation10 + $0x238] ss:$28 sps:$4 sm:$0xff]  }
 0x195   :  { %852 = vmatpush1.bf16.msra.mxu1 %v3225_v34  ;;  %v3289_v34 = vld [vmem:[#allocation10 + $0x230] ss:$28 sps:$4 sm:$0xff]  }
 0x196   :  { %2405 = vmatprep.subr.bf16.mxu1 %v3234_v38  ;;  %v3295_v38 = vld [vmem:[#allocation10 + $0x268] ss:$28 sps:$4 sm:$0xff]  }
 0x22b   :  { %v359_v46 = vpop.f32.mrb[4].mxu1 }
 0x22c   :  { %v360_v47 = vadd.f32 %v359_v46, %v238_v44  ;;  %v361_v48 = vpop.f32.mrb[5].mxu1  ;;  %v3306_v44 = vld [vmem:[#allocation10 + $0x2ac] ss:$28 sps:$4 sm:$0xff]  }
 0x22d   :  { %v362_v49 = vadd.f32 %v361_v48, %v242_v45  ;;  %v363_v50 = vpop.f32.mrb[6].mxu1  ;;  %v3301_v45 = vld [vmem:[#allocation10 + $0x2a0] ss:$28 sps:$4 sm:$0xff]   ;;  %v3304_v46 = vld [vmem:[#allocation10 + $0x2a8] ss:$28 sps:$4 sm:$0xff]  }
 0x22e   :  { %vm366_vm2 = vcmp.gt.f32.partialorder %v360_v47, 0.0  ;;  %v368_v51 = vmul.f32 0.001, %v360_v47  ;;  %v364_v52 = vpop.f32.mrb[7].mxu1  ;;  %v3312_v48 = vld [vmem:[#allocation10 + $0x2e4] ss:$28 sps:$4 sm:$0xff]  }
 0x22f   :  { %v369_v53 = vmul.f32 0.001, %v362_v49  ;;  %vm367_vm3 = vcmp.gt.f32.partialorder %v362_v49, 0.0  ;;  %v3310_v50 = vld [vmem:[#allocation10 + $0x2e0] ss:$28 sps:$4 sm:$0xff]  }
 0x230   :  { %v370_v54 = vsel %vm366_vm2, %v360_v47, %v368_v51  ;;  %v3309_v47 = vld [vmem:[#allocation10 + $0x2dc] ss:$28 sps:$4 sm:$0xff]   ;;  %v3315_v51 = vld [vmem:[#allocation10 + $0x314] ss:$28 sps:$4 sm:$0xff]  }
 0x231   :  { %v371_v55 = vsel %vm367_vm3, %v362_v49, %v369_v53  ;;  %v372_v59 = vpack.c.bf16 %v370_v54, %v370_v54  ;;  %v3307_v49 = vld [vmem:[#allocation10 + $0x2d8] ss:$28 sps:$4 sm:$0xff]   ;;  %v3313_v53 = vld [vmem:[#allocation10 + $0x310] ss:$28 sps:$4 sm:$0xff]  }
 0x232   :  { %v373_v56 = vpack.c.bf16 %v371_v55, %v371_v55  ;;  %v3318_v52 = vld [vmem:[#allocation10 + $0x31c] ss:$28 sps:$4 sm:$0xff]   ;;  %v3321_v55 = vld [vmem:[#allocation10 + $0x34c] ss:$28 sps:$4 sm:$0xff]  }
 0x233   :  { %v3316_v54 = vld [vmem:[#allocation10 + $0x318] ss:$28 sps:$4 sm:$0xff]  }
 0x234   :  { %812 = vmatprep.mubr.bf16.mxu0 %v373_v56  ;;  %853 = vmatprep.mubr.bf16.mxu1 %v373_v56  ;;  %v3324_v56 = vld [vmem:[#allocation10 + $0x354] ss:$28 sps:$4 sm:$0xff]  }
 0x235   :  { %813 = vmatmul.mubr.bf16.vlgmr.msra.gmra.mrb[0].mxu0 %v372_v59  ;;  %854 = vmatmul.mubr.bf16.vlgmr.msra.gmra.mrb[8].mxu1 %v372_v59  ;;  %v3327_v59 = vld [vmem:[#allocation10 + $0x384] ss:$28 sps:$4 sm:$0xff]  }
 0x236   :  { %2324 = vmatpush1.bf16.msra.mxu0 %v3229_v57  ;;  %2406 = vmatpush1.bf16.msra.mxu1 %v3232_v58  ;;  %v3319_v57 = vld [vmem:[#allocation10 + $0x348] ss:$28 sps:$4 sm:$0xff]   ;;  %v3322_v58 = vld [vmem:[#allocation10 + $0x350] ss:$28 sps:$4 sm:$0xff]  }
 0x237   :  { %2325 = vmatprep.subr.bf16.mxu0 %v3237_v60  ;;  %2407 = vmatprep.subr.bf16.mxu1 %v3240_v61  ;;  %v3330_v60 = vld [vmem:[#allocation10 + $0x38c] ss:$28 sps:$4 sm:$0xff]   ;;  %v3856_v61 = vld [vmem:[%s3927_s6] sm:$0xf] }
 0x23a   :  { %2326 = vmatpush1.bf16.msra.mxu0 %v3235_v62  ;;  %2408 = vmatpush1.bf16.msra.mxu1 %v3238_v63  ;;  %v454_v62 = vsub.s32 3, %v3840_v40  ;;  %v443_v63 = vrot.slane %v3856_v61, %v3843_v41 }
 0x23b   :  { %2327 = vmatprep.subr.bf16.mxu0 %v3243_v0  ;;  %2409 = vmatprep.subr.bf16.mxu1 %v3246_v1  ;;  %v447_v0 = vrot.slane %v3856_v61, %v3849_v43 }
 0x23c   :  { %v455_v1 = vrot.slane %v3856_v61, %v454_v62 }
 0x23e   :  { %2328 = vmatpush1.bf16.msra.mxu0 %v3241_v2  ;;  %2410 = vmatpush1.bf16.msra.mxu1 %v3244_v3 }
 0x23f   :  { %2329 = vmatprep.subr.bf16.mxu0 %v3249_v4  ;;  %2411 = vmatprep.subr.bf16.mxu1 %v3252_v5 }
 0x242   :  { %2330 = vmatpush1.bf16.msra.mxu0 %v3247_v6  ;;  %2412 = vmatpush1.bf16.msra.mxu1 %v3250_v7 }
 0x243   :  { %2331 = vmatprep.subr.bf16.mxu0 %v3255_v8  ;;  %2413 = vmatprep.subr.bf16.mxu1 %v3258_v9 }
 0x246   :  { %2332 = vmatpush1.bf16.msra.mxu0 %v3253_v10  ;;  %2414 = vmatpush1.bf16.msra.mxu1 %v3256_v11 }
 0x247   :  { %2333 = vmatprep.subr.bf16.mxu0 %v3261_v12  ;;  %2415 = vmatprep.subr.bf16.mxu1 %v3264_v13 }
 0x24a   :  { %2334 = vmatpush1.bf16.msra.mxu0 %v3259_v14  ;;  %2416 = vmatpush1.bf16.msra.mxu1 %v3262_v15 }
 0x24b   :  { %2335 = vmatprep.subr.bf16.mxu0 %v3267_v16  ;;  %2417 = vmatprep.subr.bf16.mxu1 %v3270_v17 }
 0x24e   :  { %2336 = vmatpush1.bf16.msra.mxu0 %v3265_v18  ;;  %2418 = vmatpush1.bf16.msra.mxu1 %v3268_v19 }
 0x24f   :  { %2337 = vmatprep.subr.bf16.mxu0 %v3273_v20  ;;  %2419 = vmatprep.subr.bf16.mxu1 %v3276_v21  ;;  %v3325_v20 = vld [vmem:[#allocation10 + $0x380] ss:$28 sps:$4 sm:$0xff]   ;;  %v3328_v21 = vld [vmem:[#allocation10 + $0x388] ss:$28 sps:$4 sm:$0xff]  }
 0x252   :  { %2338 = vmatpush1.bf16.msra.mxu0 %v3271_v22  ;;  %2420 = vmatpush1.bf16.msra.mxu1 %v3274_v23  ;;  %v3333_v23 = vld [vmem:[#allocation10 + $0x3bc] ss:$28 sps:$4 sm:$0xff]  }
 0x253   :  { %2339 = vmatprep.subr.bf16.mxu0 %v3279_v24  ;;  %2421 = vmatprep.subr.bf16.mxu1 %v3282_v25  ;;  %v3336_v24 = vld [vmem:[#allocation10 + $0x3c4] ss:$28 sps:$4 sm:$0xff]  }
 0x256   :  { %2340 = vmatpush1.bf16.msra.mxu0 %v3277_v26  ;;  %2422 = vmatpush1.bf16.msra.mxu1 %v3280_v27  ;;  %v3331_v26 = vld [vmem:[#allocation10 + $0x3b8] ss:$28 sps:$4 sm:$0xff]   ;;  %v3334_v27 = vld [vmem:[#allocation10 + $0x3c0] ss:$28 sps:$4 sm:$0xff]  }
 0x257   :  { %2341 = vmatprep.subr.bf16.mxu0 %v3285_v28  ;;  %2423 = vmatprep.subr.bf16.mxu1 %v3288_v29  ;;  %v3339_v28 = vld [vmem:[#allocation10 + $0x3f4] ss:$28 sps:$4 sm:$0xff]   ;;  %v3342_v29 = vld [vmem:[#allocation10 + $0x3fc] ss:$28 sps:$4 sm:$0xff]  }
 0x25a   :  { %2342 = vmatpush1.bf16.msra.mxu0 %v3283_v30  ;;  %2424 = vmatpush1.bf16.msra.mxu1 %v3286_v31  ;;  %v3337_v30 = vld [vmem:[#allocation10 + $0x3f0] ss:$28 sps:$4 sm:$0xff]   ;;  %v3340_v31 = vld [vmem:[#allocation10 + $0x3f8] ss:$28 sps:$4 sm:$0xff]  }
 0x25b   :  { %2343 = vmatprep.subr.bf16.mxu0 %v3291_v32  ;;  %2425 = vmatprep.subr.bf16.mxu1 %v3294_v33  ;;  %v3345_v32 = vld [vmem:[#allocation10 + $0x42c] ss:$28 sps:$4 sm:$0xff]   ;;  %v3348_v33 = vld [vmem:[#allocation10 + $0x434] ss:$28 sps:$4 sm:$0xff]  }
 0x25e   :  { %2344 = vmatpush1.bf16.msra.mxu0 %v3289_v34  ;;  %2426 = vmatpush1.bf16.msra.mxu1 %v3292_v35  ;;  %v3343_v34 = vld [vmem:[#allocation10 + $0x428] ss:$28 sps:$4 sm:$0xff]   ;;  %v3346_v35 = vld [vmem:[#allocation10 + $0x430] ss:$28 sps:$4 sm:$0xff]  }
 0x25f   :  { %2345 = vmatprep.subr.bf16.mxu0 %v3297_v36  ;;  %2427 = vmatprep.subr.bf16.mxu1 %v3300_v37  ;;  %v3351_v36 = vld [vmem:[#allocation10 + $0x464] ss:$28 sps:$4 sm:$0xff]   ;;  %v3354_v37 = vld [vmem:[#allocation10 + $0x46c] ss:$28 sps:$4 sm:$0xff]  }
 0x262   :  { %2346 = vmatpush1.bf16.msra.mxu0 %v3295_v38  ;;  %2428 = vmatpush1.bf16.msra.mxu1 %v3298_v39  ;;  %v3349_v38 = vld [vmem:[#allocation10 + $0x460] ss:$28 sps:$4 sm:$0xff]   ;;  %v3352_v39 = vld [vmem:[#allocation10 + $0x468] ss:$28 sps:$4 sm:$0xff]  }
 0x263   :  { %2347 = vmatprep.subr.bf16.mxu0 %v3303_v42  ;;  %2429 = vmatprep.subr.bf16.mxu1 %v3306_v44  ;;  %v3357_v42 = vld [vmem:[#allocation10 + $0x49c] ss:$28 sps:$4 sm:$0xff]   ;;  %v3360_v44 = vld [vmem:[#allocation10 + $0x4a4] ss:$28 sps:$4 sm:$0xff]  }
 0x266   :  { %2348 = vmatpush1.bf16.msra.mxu0 %v3301_v45  ;;  %2430 = vmatpush1.bf16.msra.mxu1 %v3304_v46  ;;  %v3355_v45 = vld [vmem:[#allocation10 + $0x498] ss:$28 sps:$4 sm:$0xff]   ;;  %v3358_v46 = vld [vmem:[#allocation10 + $0x4a0] ss:$28 sps:$4 sm:$0xff]  }
 0x267   :  { %2349 = vmatprep.subr.bf16.mxu0 %v3309_v47  ;;  %2431 = vmatprep.subr.bf16.mxu1 %v3312_v48  ;;  %v3363_v47 = vld [vmem:[#allocation10 + $0x4d4] ss:$28 sps:$4 sm:$0xff]   ;;  %v3366_v48 = vld [vmem:[#allocation10 + $0x4dc] ss:$28 sps:$4 sm:$0xff]  }
 0x26a   :  { %2350 = vmatpush1.bf16.msra.mxu0 %v3307_v49  ;;  %2432 = vmatpush1.bf16.msra.mxu1 %v3310_v50  ;;  %v3361_v49 = vld [vmem:[#allocation10 + $0x4d0] ss:$28 sps:$4 sm:$0xff]   ;;  %v3364_v50 = vld [vmem:[#allocation10 + $0x4d8] ss:$28 sps:$4 sm:$0xff]  }
 0x26b   :  { %2351 = vmatprep.subr.bf16.mxu0 %v3315_v51  ;;  %2433 = vmatprep.subr.bf16.mxu1 %v3318_v52  ;;  %v3369_v51 = vld [vmem:[#allocation10 + $0x50c] ss:$28 sps:$4 sm:$0xff]   ;;  %v3372_v52 = vld [vmem:[#allocation10 + $0x514] ss:$28 sps:$4 sm:$0xff]  }
 0x26e   :  { %2352 = vmatpush1.bf16.msra.mxu0 %v3313_v53  ;;  %2434 = vmatpush1.bf16.msra.mxu1 %v3316_v54  ;;  %v3367_v53 = vld [vmem:[#allocation10 + $0x508] ss:$28 sps:$4 sm:$0xff]   ;;  %v3370_v54 = vld [vmem:[#allocation10 + $0x510] ss:$28 sps:$4 sm:$0xff]  }
 0x26f   :  { %2353 = vmatprep.subr.bf16.mxu0 %v3321_v55  ;;  %2435 = vmatprep.subr.bf16.mxu1 %v3324_v56  ;;  %v3375_v55 = vld [vmem:[#allocation10 + $0x544] ss:$28 sps:$4 sm:$0xff]   ;;  %v3378_v56 = vld [vmem:[#allocation10 + $0x54c] ss:$28 sps:$4 sm:$0xff]  }
 0x272   :  { %2354 = vmatpush1.bf16.msra.mxu0 %v3319_v57  ;;  %2436 = vmatpush1.bf16.msra.mxu1 %v3322_v58  ;;  %v3373_v57 = vld [vmem:[#allocation10 + $0x540] ss:$28 sps:$4 sm:$0xff]   ;;  %v3376_v58 = vld [vmem:[#allocation10 + $0x548] ss:$28 sps:$4 sm:$0xff]  }
 0x273   :  { %2364 = vmatprep.subr.bf16.mxu0 %v3327_v59  ;;  %2446 = vmatprep.subr.bf16.mxu1 %v3330_v60  ;;  %v3381_v59 = vld [vmem:[#allocation10 + $0x57c] ss:$28 sps:$4 sm:$0xff]   ;;  %v3384_v60 = vld [vmem:[#allocation10 + $0x584] ss:$28 sps:$4 sm:$0xff]  }
 0x308   :  { %v814_v2 = vpop.f32.mrb[0].mxu0  ;;  %v3866_v3 = vpop.f32.mrb[8].mxu1 }
 0x309   :  { %v815_v4 = vadd.f32 %v814_v2, %v443_v63  ;;  %v816_v5 = vpop.f32.mrb[1].mxu0  ;;  %v857_v6 = vpop.f32.mrb[9].mxu1  ;;  %v3379_v63 = vld [vmem:[#allocation10 + $0x578] ss:$28 sps:$4 sm:$0xff]  }
 0x30a   :  { %v817_v7 = vadd.f32 %v816_v5, %v447_v0  ;;  %v858_v8 = vadd.f32 %v857_v6, %v455_v1  ;;  %v818_v9 = vpop.f32.mrb[2].mxu0  ;;  %v859_v10 = vpop.f32.mrb[10].mxu1  ;;  %v3382_v0 = vld [vmem:[#allocation10 + $0x580] ss:$28 sps:$4 sm:$0xff]   ;;  %v3387_v1 = vld [vmem:[#allocation10 + $0x5b4] ss:$28 sps:$4 sm:$0xff]  }
 0x30b   :  { %vm862_vm4 = vcmp.gt.f32.partialorder %v815_v4, 0.0  ;;  %v866_v11 = vmul.f32 0.001, %v815_v4  ;;  %v819_v15 = vpop.f32.mrb[3].mxu0  ;;  %v860_v16 = vpop.f32.mrb[11].mxu1 }
 0x30c   :  { %vm863_vm5 = vcmp.gt.f32.partialorder %v817_v7, 0.0  ;;  %v867_v12 = vmul.f32 0.001, %v817_v7  ;;  %vm865_vm6 = vcmp.gt.f32.partialorder %v858_v8, 0.0  ;;  %v869_v13 = vmul.f32 0.001, %v858_v8 }
 0x30d   :  { %v870_v14 = vsel %vm862_vm4, %v815_v4, %v866_v11  ;;  %v3390_v2 = vld [vmem:[#allocation10 + $0x5bc] ss:$28 sps:$4 sm:$0xff]   ;;  %v3385_v4 = vld [vmem:[#allocation10 + $0x5b0] ss:$28 sps:$4 sm:$0xff]   ;;  %v3399_v10 = vld [vmem:[#allocation10 + $0x624] ss:$28 sps:$4 sm:$0xff]  }
 0x30e   :  { %v871_v17 = vsel %vm863_vm5, %v817_v7, %v867_v12  ;;  %v873_v19 = vsel %vm865_vm6, %v858_v8, %v869_v13  ;;  %v3870_v22 = vpack.c.bf16 %v870_v14, %v870_v14  ;;  %v3388_v5 = vld [vmem:[#allocation10 + $0x5b8] ss:$28 sps:$4 sm:$0xff]   ;;  %v3393_v6 = vld [vmem:[#allocation10 + $0x5ec] ss:$28 sps:$4 sm:$0xff]   ;;  %v450_v12 = vsub.s32 2, %v3840_v40 }
 0x30f   :  { %v3868_v18 = vpack.c.bf16 %v871_v17, %v871_v17  ;;  %v3874_v25 = vpack.c.bf16 %v873_v19, %v873_v19  ;;  %v3396_v7 = vld [vmem:[#allocation10 + $0x5f4] ss:$28 sps:$4 sm:$0xff]   ;;  %v3391_v8 = vld [vmem:[#allocation10 + $0x5e8] ss:$28 sps:$4 sm:$0xff]   ;;  %v3397_v13 = vld [vmem:[#allocation10 + $0x620] ss:$28 sps:$4 sm:$0xff]  }
 0x310   :  { %v3394_v9 = vld [vmem:[#allocation10 + $0x5f0] ss:$28 sps:$4 sm:$0xff]   ;;  %v3400_v14 = vld [vmem:[#allocation10 + $0x628] ss:$28 sps:$4 sm:$0xff]   ;;  %v3405_v15 = vld [vmem:[#allocation10 + $0x65c] ss:$28 sps:$4 sm:$0xff]   ;;  %v451_v17 = vrot.slane %v3856_v61, %v450_v12 }
 0x311   :  { %2355 = vmatprep.mubr.bf16.mxu0 %v3868_v18  ;;  %2437 = vmatprep.mubr.bf16.mxu1 %v3868_v18  ;;  %v3402_v11 = vld [vmem:[#allocation10 + $0x62c] ss:$28 sps:$4 sm:$0xff]   ;;  %v3408_v16 = vld [vmem:[#allocation10 + $0x664] ss:$28 sps:$4 sm:$0xff]   ;;  %v3403_v19 = vld [vmem:[#allocation10 + $0x658] ss:$28 sps:$4 sm:$0xff]  }
 0x312   :  { %2356 = vmatmul.mubr.bf16.vlgmr.msra.gmra.mrb[4].mxu0 %v3870_v22  ;;  %2438 = vmatmul.mubr.bf16.vlgmr.msra.gmra.mrb[12].mxu1 %v3870_v22  ;;  %v3415_v61 = vld [vmem:[#allocation10 + $0x6c8] ss:$28 sps:$4 sm:$0xff]  }
 0x313   :  { %2365 = vmatpush1.bf16.msra.mxu0 %v3325_v20  ;;  %2447 = vmatpush1.bf16.msra.mxu1 %v3328_v21  ;;  %v3406_v20 = vld [vmem:[#allocation10 + $0x660] ss:$28 sps:$4 sm:$0xff]   ;;  %v3411_v21 = vld [vmem:[#allocation10 + $0x694] ss:$28 sps:$4 sm:$0xff]  }
 0x314   :  { %2396 = vmatprep.mubr.bf16.mxu0 %v3874_v25  ;;  %2478 = vmatprep.mubr.bf16.mxu1 %v3874_v25 }
 0x315   :  { %2366 = vmatprep.subr.bf16.mxu0 %v3333_v23  ;;  %2448 = vmatprep.subr.bf16.mxu1 %v3336_v24  ;;  %v3414_v23 = vld [vmem:[#allocation10 + $0x69c] ss:$28 sps:$4 sm:$0xff]   ;;  %v856_v24 = vadd.f32 %v3866_v3, %v451_v17  ;;  %v3421_v3 = vld [vmem:[#allocation10 + $0x10] ss:$28 sps:$4 sm:$0xff]  }
 0x316   :  { %v3471_v17 = vld [vmem:[#allocation10 + $0x240] ss:$28 sps:$4 sm:$0xff]  }
 0x317   :  { %2367 = vmatpush1.bf16.msra.mxu0 %v3331_v26  ;;  %2449 = vmatpush1.bf16.msra.mxu1 %v3334_v27  ;;  %v3409_v26 = vld [vmem:[#allocation10 + $0x690] ss:$28 sps:$4 sm:$0xff]   ;;  %v3412_v27 = vld [vmem:[#allocation10 + $0x698] ss:$28 sps:$4 sm:$0xff]   ;;  %vm864_vm7 = vcmp.gt.f32.partialorder %v856_v24, 0.0 }
 0x318   :  { %2368 = vmatprep.subr.bf16.mxu0 %v3339_v28  ;;  %2450 = vmatprep.subr.bf16.mxu1 %v3342_v29  ;;  %v3417_v28 = vld [vmem:[#allocation10 + $0x6cc] ss:$28 sps:$4 sm:$0xff]   ;;  %v3420_v29 = vld [vmem:[#allocation10 + $0x6d4] ss:$28 sps:$4 sm:$0xff]  }
 0x31b   :  { %2369 = vmatpush1.bf16.msra.mxu0 %v3337_v30  ;;  %2451 = vmatpush1.bf16.msra.mxu1 %v3340_v31  ;;  %v868_v30 = vmul.f32 0.001, %v856_v24  ;;  %v3418_v31 = vld [vmem:[#allocation10 + $0x6d0] ss:$28 sps:$4 sm:$0xff]  }
 0x31c   :  { %2370 = vmatprep.subr.bf16.mxu0 %v3345_v32  ;;  %2452 = vmatprep.subr.bf16.mxu1 %v3348_v33  ;;  %v3423_v32 = vld [vmem:[#allocation10 + $0x14] ss:$28 sps:$4 sm:$0xff]  }
 0x31d   :  { %v3424_v33 = vld [vmem:[#allocation10 + $0x1d8] ss:$28 sps:$4 sm:$0xff]  }
 0x31f   :  { %2371 = vmatpush1.bf16.msra.mxu0 %v3343_v34  ;;  %2453 = vmatpush1.bf16.msra.mxu1 %v3346_v35  ;;  %v872_v34 = vsel %vm864_vm7, %v856_v24, %v868_v30  ;;  %v3480_v24 = vld [vmem:[#allocation10 + $0x440] ss:$28 sps:$4 sm:$0xff]   ;;  %v3488_v30 = vld [vmem:[#allocation10 + $0x2ec] ss:$28 sps:$4 sm:$0xff]  }
 0x320   :  { %2372 = vmatprep.subr.bf16.mxu0 %v3351_v36  ;;  %2454 = vmatprep.subr.bf16.mxu1 %v3354_v37  ;;  %v3885_v35 = vpack.c.bf16 %v872_v34, %v872_v34  ;;  %v3425_v36 = vld [vmem:[#allocation10 + $0x18] ss:$28 sps:$4 sm:$0xff]   ;;  %v3428_v37 = vld [vmem:[#allocation10 + $0x4c] ss:$28 sps:$4 sm:$0xff]  }
 0x321   :  { %v3494_v34 = vld [vmem:[#allocation10 + $0x6a8] ss:$28 sps:$4 sm:$0xff]  }
 0x323   :  { %2373 = vmatpush1.bf16.msra.mxu0 %v3349_v38  ;;  %2455 = vmatpush1.bf16.msra.mxu1 %v3352_v39  ;;  %v3429_v38 = vld [vmem:[#allocation10 + $0x210] ss:$28 sps:$4 sm:$0xff]   ;;  %v3426_v39 = vld [vmem:[#allocation10 + $0x48] ss:$28 sps:$4 sm:$0xff]  }
 0x324   :  { %2374 = vmatprep.subr.bf16.mxu0 %v3357_v42  ;;  %2456 = vmatprep.subr.bf16.mxu1 %v3360_v44  ;;  %v3430_v42 = vld [vmem:[#allocation10 + $0x50] ss:$28 sps:$4 sm:$0xff]   ;;  %v3433_v44 = vld [vmem:[#allocation10 + $0x84] ss:$28 sps:$4 sm:$0xff]  }
 0x327   :  { %2375 = vmatpush1.bf16.msra.mxu0 %v3355_v45  ;;  %2457 = vmatpush1.bf16.msra.mxu1 %v3358_v46  ;;  %v3434_v45 = vld [vmem:[#allocation10 + $0x248] ss:$28 sps:$4 sm:$0xff]   ;;  %v3431_v46 = vld [vmem:[#allocation10 + $0x80] ss:$28 sps:$4 sm:$0xff]  }
 0x328   :  { %2376 = vmatprep.subr.bf16.mxu0 %v3363_v47  ;;  %2458 = vmatprep.subr.bf16.mxu1 %v3366_v48  ;;  %v3435_v47 = vld [vmem:[#allocation10 + $0x88] ss:$28 sps:$4 sm:$0xff]   ;;  %v3438_v48 = vld [vmem:[#allocation10 + $0xbc] ss:$28 sps:$4 sm:$0xff]  }
 0x32b   :  { %2377 = vmatpush1.bf16.msra.mxu0 %v3361_v49  ;;  %2459 = vmatpush1.bf16.msra.mxu1 %v3364_v50  ;;  %v3439_v49 = vld [vmem:[#allocation10 + $0x280] ss:$28 sps:$4 sm:$0xff]   ;;  %v3436_v50 = vld [vmem:[#allocation10 + $0xb8] ss:$28 sps:$4 sm:$0xff]  }
 0x32c   :  { %2378 = vmatprep.subr.bf16.mxu0 %v3369_v51  ;;  %2460 = vmatprep.subr.bf16.mxu1 %v3372_v52  ;;  %v3440_v51 = vld [vmem:[#allocation10 + $0xc0] ss:$28 sps:$4 sm:$0xff]   ;;  %v3443_v52 = vld [vmem:[#allocation10 + $0xf4] ss:$28 sps:$4 sm:$0xff]  }
 0x32f   :  { %2379 = vmatpush1.bf16.msra.mxu0 %v3367_v53  ;;  %2461 = vmatpush1.bf16.msra.mxu1 %v3370_v54  ;;  %v3441_v53 = vld [vmem:[#allocation10 + $0xf0] ss:$28 sps:$4 sm:$0xff]   ;;  %v3445_v54 = vld [vmem:[#allocation10 + $0xf8] ss:$28 sps:$4 sm:$0xff]  }
 0x330   :  { %2380 = vmatprep.subr.bf16.mxu0 %v3375_v55  ;;  %2462 = vmatprep.subr.bf16.mxu1 %v3378_v56  ;;  %v3448_v55 = vld [vmem:[#allocation10 + $0x12c] ss:$28 sps:$4 sm:$0xff]  }
 0x331   :  { %v3449_v56 = vld [vmem:[#allocation10 + $0x2f0] ss:$28 sps:$4 sm:$0xff]  }
 0x333   :  { %2381 = vmatpush1.bf16.msra.mxu0 %v3373_v57  ;;  %2463 = vmatpush1.bf16.msra.mxu1 %v3376_v58  ;;  %v3446_v57 = vld [vmem:[#allocation10 + $0x128] ss:$28 sps:$4 sm:$0xff]   ;;  %v3450_v58 = vld [vmem:[#allocation10 + $0x130] ss:$28 sps:$4 sm:$0xff]  }
 0x334   :  { %2382 = vmatprep.subr.bf16.mxu0 %v3381_v59  ;;  %2464 = vmatprep.subr.bf16.mxu1 %v3384_v60  ;;  %v3453_v59 = vld [vmem:[#allocation10 + $0x164] ss:$28 sps:$4 sm:$0xff]  }
 0x335   :  { %v3454_v60 = vld [vmem:[#allocation10 + $0x328] ss:$28 sps:$4 sm:$0xff]  }
 0x337   :  { %2383 = vmatpush1.bf16.msra.mxu0 %v3379_v63  ;;  %2465 = vmatpush1.bf16.msra.mxu1 %v3382_v0  ;;  %v3451_v63 = vld [vmem:[#allocation10 + $0x160] ss:$28 sps:$4 sm:$0xff]   ;;  %v3455_v0 = vld [vmem:[#allocation10 + $0x168] ss:$28 sps:$4 sm:$0xff]  }
 0x338   :  { %2384 = vmatprep.subr.bf16.mxu0 %v3387_v1  ;;  %2466 = vmatprep.subr.bf16.mxu1 %v3390_v2  ;;  %v3458_v1 = vld [vmem:[#allocation10 + $0x19c] ss:$28 sps:$4 sm:$0xff]  }
 0x339   :  { %v3459_v2 = vld [vmem:[#allocation10 + $0x360] ss:$28 sps:$4 sm:$0xff]  }
 0x33b   :  { %2385 = vmatpush1.bf16.msra.mxu0 %v3385_v4  ;;  %2467 = vmatpush1.bf16.msra.mxu1 %v3388_v5  ;;  %v3456_v4 = vld [vmem:[#allocation10 + $0x198] ss:$28 sps:$4 sm:$0xff]   ;;  %v3460_v5 = vld [vmem:[#allocation10 + $0x1a0] ss:$28 sps:$4 sm:$0xff]  }
 0x33c   :  { %2386 = vmatprep.subr.bf16.mxu0 %v3393_v6  ;;  %2468 = vmatprep.subr.bf16.mxu1 %v3396_v7  ;;  %v3463_v6 = vld [vmem:[#allocation10 + $0x1d4] ss:$28 sps:$4 sm:$0xff]  }
 0x33d   :  { %v3464_v7 = vld [vmem:[#allocation10 + $0x558] ss:$28 sps:$4 sm:$0xff]  }
 0x33f   :  { %2387 = vmatpush1.bf16.msra.mxu0 %v3391_v8  ;;  %2469 = vmatpush1.bf16.msra.mxu1 %v3394_v9  ;;  %v3461_v8 = vld [vmem:[#allocation10 + $0x1d0] ss:$28 sps:$4 sm:$0xff]   ;;  %v3465_v9 = vld [vmem:[#allocation10 + $0x398] ss:$28 sps:$4 sm:$0xff]  }
 0x340   :  { %2388 = vmatprep.subr.bf16.mxu0 %v3399_v10  ;;  %2470 = vmatprep.subr.bf16.mxu1 %v3402_v11  ;;  %v3468_v10 = vld [vmem:[#allocation10 + $0x20c] ss:$28 sps:$4 sm:$0xff]  }
 0x341   :  { %v3469_v11 = vld [vmem:[#allocation10 + $0x590] ss:$28 sps:$4 sm:$0xff]  }
 0x343   :  { %2389 = vmatpush1.bf16.msra.mxu0 %v3397_v13  ;;  %2471 = vmatpush1.bf16.msra.mxu1 %v3400_v14  ;;  %v3466_v13 = vld [vmem:[#allocation10 + $0x208] ss:$28 sps:$4 sm:$0xff]   ;;  %v3470_v14 = vld [vmem:[#allocation10 + $0x3d0] ss:$28 sps:$4 sm:$0xff]  }
 0x344   :  { %2390 = vmatprep.subr.bf16.mxu0 %v3405_v15  ;;  %2472 = vmatprep.subr.bf16.mxu1 %v3408_v16  ;;  %v3473_v15 = vld [vmem:[#allocation10 + $0x244] ss:$28 sps:$4 sm:$0xff]  }
 0x345   :  { %v3474_v16 = vld [vmem:[#allocation10 + $0x5c8] ss:$28 sps:$4 sm:$0xff]  }
 0x347   :  { %2391 = vmatpush1.bf16.msra.mxu0 %v3403_v19  ;;  %2473 = vmatpush1.bf16.msra.mxu1 %v3406_v20  ;;  %v3475_v19 = vld [vmem:[#allocation10 + $0x408] ss:$28 sps:$4 sm:$0xff]   ;;  %v3478_v20 = vld [vmem:[#allocation10 + $0x27c] ss:$28 sps:$4 sm:$0xff]  }
 0x348   :  { %2392 = vmatprep.subr.bf16.mxu0 %v3411_v21  ;;  %2474 = vmatprep.subr.bf16.mxu1 %v3414_v23  ;;  %v3479_v21 = vld [vmem:[#allocation10 + $0x600] ss:$28 sps:$4 sm:$0xff]   ;;  %v3476_v23 = vld [vmem:[#allocation10 + $0x278] ss:$28 sps:$4 sm:$0xff]  }
 0x34b   :  { %2393 = vmatpush1.bf16.msra.mxu0 %v3409_v26  ;;  %2475 = vmatpush1.bf16.msra.mxu1 %v3412_v27  ;;  %v3483_v26 = vld [vmem:[#allocation10 + $0x2b4] ss:$28 sps:$4 sm:$0xff]  }
 0x34c   :  { %2394 = vmatprep.subr.bf16.mxu0 %v3417_v28  ;;  %2476 = vmatprep.subr.bf16.mxu1 %v3420_v29  ;;  %v3484_v27 = vld [vmem:[#allocation10 + $0x638] ss:$28 sps:$4 sm:$0xff]   ;;  %v3481_v28 = vld [vmem:[#allocation10 + $0x2b0] ss:$28 sps:$4 sm:$0xff]  }
 0x34d   :  { %v3485_v29 = vld [vmem:[#allocation10 + $0x478] ss:$28 sps:$4 sm:$0xff]  }
 0x34f   :  { %2395 = vmatpush1.bf16.msra.mxu0 %v3415_v61  ;;  %2477 = vmatpush1.bf16.msra.mxu1 %v3418_v31  ;;  %v3489_v61 = vld [vmem:[#allocation10 + $0x670] ss:$28 sps:$4 sm:$0xff]   ;;  %v3486_v31 = vld [vmem:[#allocation10 + $0x2e8] ss:$28 sps:$4 sm:$0xff]  }
 0x350   :  { %2487 = vmatprep.subr.bf16.mxu0 %v3423_v32  ;;  %3002 = vmatprep.subr.bf16.mxu1 %v3424_v33  ;;  %v3490_v32 = vld [vmem:[#allocation10 + $0x4b0] ss:$28 sps:$4 sm:$0xff]   ;;  %v3493_v33 = vld [vmem:[#allocation10 + $0x324] ss:$28 sps:$4 sm:$0xff]  }
 0x352   :  { %2397 = vmatmul.mubr.bf16.vlgmr.msra.gmra.mrb[4].mxu0 %v3885_v35  ;;  %2479 = vmatmul.mubr.bf16.vlgmr.msra.gmra.mrb[12].mxu1 %v3885_v35 }
 0x353   :  { %2488 = vmatpush1.bf16.msra.mxu0 %v3421_v3  ;;  %2519 = vmatprep.mubr.bf16.mxu0 %v3868_v18  ;;  %v3491_v3 = vld [vmem:[#allocation10 + $0x320] ss:$28 sps:$4 sm:$0xff]  }
 0x354   :  { %3003 = vmatpush3.bf16.msra.mxu1 %v3425_v36  ;;  %2601 = vmatprep.mubr.bf16.mxu1 %v3868_v18  ;;  %v3444_v18 = vld [vmem:[#allocation10 + $0x2b8] ss:$28 sps:$4 sm:$0xff]   ;;  %v3495_v36 = vld [vmem:[#allocation10 + $0x4e8] ss:$28 sps:$4 sm:$0xff]  }
 0x355   :  { %2489 = vmatprep.subr.bf16.mxu0 %v3428_v37  ;;  %3004 = vmatprep.subr.bf16.mxu1 %v3429_v38  ;;  %v3498_v37 = vld [vmem:[#allocation10 + $0x35c] ss:$28 sps:$4 sm:$0xff]  }
 0x356   :  { %v3499_v38 = vld [vmem:[#allocation10 + $0x6e0] ss:$28 sps:$4 sm:$0xff]  }
 0x357   :  { %2490 = vmatpush1.bf16.msra.mxu0 %v3426_v39  ;;  %v3496_v39 = vld [vmem:[#allocation10 + $0x358] ss:$28 sps:$4 sm:$0xff]  }
 0x358   :  { %3005 = vmatpush3.bf16.msra.mxu1 %v3430_v42  ;;  %2491 = vmatprep.subr.bf16.mxu0 %v3433_v44  ;;  %v3500_v42 = vld [vmem:[#allocation10 + $0x520] ss:$28 sps:$4 sm:$0xff]   ;;  %v3503_v44 = vld [vmem:[#allocation10 + $0x394] ss:$28 sps:$4 sm:$0xff]  }
 0x359   :  { %3006 = vmatprep.subr.bf16.mxu1 %v3434_v45  ;;  %v3501_v45 = vld [vmem:[#allocation10 + $0x390] ss:$28 sps:$4 sm:$0xff]  }
 0x35b   :  { %2492 = vmatpush1.bf16.msra.mxu0 %v3431_v46  ;;  %v3506_v46 = vld [vmem:[#allocation10 + $0x3cc] ss:$28 sps:$4 sm:$0xff]  }
 0x35c   :  { %3007 = vmatpush3.bf16.msra.mxu1 %v3435_v47  ;;  %2493 = vmatprep.subr.bf16.mxu0 %v3438_v48  ;;  %v3504_v47 = vld [vmem:[#allocation10 + $0x3c8] ss:$28 sps:$4 sm:$0xff]  }
 0x35d   :  { %3008 = vmatprep.subr.bf16.mxu1 %v3439_v49  ;;  %v3509_v48 = vld [vmem:[#allocation10 + $0x404] ss:$28 sps:$4 sm:$0xff]  }
 0x35e   :  { %v3507_v49 = vld [vmem:[#allocation10 + $0x400] ss:$28 sps:$4 sm:$0xff]  }
 0x35f   :  { %2494 = vmatpush1.bf16.msra.mxu0 %v3436_v50  ;;  %v3512_v50 = vld [vmem:[#allocation10 + $0x43c] ss:$28 sps:$4 sm:$0xff]  }
 0x360   :  { %3009 = vmatpush3.bf16.msra.mxu1 %v3440_v51  ;;  %2495 = vmatprep.subr.bf16.mxu0 %v3443_v52  ;;  %v3510_v51 = vld [vmem:[#allocation10 + $0x438] ss:$28 sps:$4 sm:$0xff]  }
 0x361   :  { %3010 = vmatprep.subr.bf16.mxu1 %v3444_v18  ;;  %v3515_v52 = vld [vmem:[#allocation10 + $0x474] ss:$28 sps:$4 sm:$0xff]  }
 0x362   :  { %v3513_v18 = vld [vmem:[#allocation10 + $0x470] ss:$28 sps:$4 sm:$0xff]  }
 0x363   :  { %2496 = vmatpush1.bf16.msra.mxu0 %v3441_v53  ;;  %v3516_v53 = vld [vmem:[#allocation10 + $0x4a8] ss:$28 sps:$4 sm:$0xff]  }
 0x364   :  { %3011 = vmatpush3.bf16.msra.mxu1 %v3445_v54  ;;  %2497 = vmatprep.subr.bf16.mxu0 %v3448_v55  ;;  %v3521_v54 = vld [vmem:[#allocation10 + $0x4e4] ss:$28 sps:$4 sm:$0xff]   ;;  %v3524_v55 = vld [vmem:[#allocation10 + $0x51c] ss:$28 sps:$4 sm:$0xff]  }
 0x365   :  { %3012 = vmatprep.subr.bf16.mxu1 %v3449_v56  ;;  %v3522_v56 = vld [vmem:[#allocation10 + $0x518] ss:$28 sps:$4 sm:$0xff]  }
 0x367   :  { %2498 = vmatpush1.bf16.msra.mxu0 %v3446_v57  ;;  %v3527_v57 = vld [vmem:[#allocation10 + $0x554] ss:$28 sps:$4 sm:$0xff]  }
 0x368   :  { %3013 = vmatpush3.bf16.msra.mxu1 %v3450_v58  ;;  %2499 = vmatprep.subr.bf16.mxu0 %v3453_v59  ;;  %v3525_v58 = vld [vmem:[#allocation10 + $0x550] ss:$28 sps:$4 sm:$0xff]  }
 0x369   :  { %3014 = vmatprep.subr.bf16.mxu1 %v3454_v60  ;;  %v3530_v59 = vld [vmem:[#allocation10 + $0x58c] ss:$28 sps:$4 sm:$0xff]  }
 0x36a   :  { %v3528_v60 = vld [vmem:[#allocation10 + $0x588] ss:$28 sps:$4 sm:$0xff]  }
 0x36b   :  { %2500 = vmatpush1.bf16.msra.mxu0 %v3451_v63  ;;  %v3533_v63 = vld [vmem:[#allocation10 + $0x5c4] ss:$28 sps:$4 sm:$0xff]  }
 0x36c   :  { %3015 = vmatpush3.bf16.msra.mxu1 %v3455_v0  ;;  %2501 = vmatprep.subr.bf16.mxu0 %v3458_v1  ;;  %v3531_v0 = vld [vmem:[#allocation10 + $0x5c0] ss:$28 sps:$4 sm:$0xff]  }
 0x36d   :  { %3016 = vmatprep.subr.bf16.mxu1 %v3459_v2  ;;  %v3536_v1 = vld [vmem:[#allocation10 + $0x5fc] ss:$28 sps:$4 sm:$0xff]  }
 0x36e   :  { %v3534_v2 = vld [vmem:[#allocation10 + $0x5f8] ss:$28 sps:$4 sm:$0xff]  }
 0x36f   :  { %2502 = vmatpush1.bf16.msra.mxu0 %v3456_v4  ;;  %v3539_v4 = vld [vmem:[#allocation10 + $0x634] ss:$28 sps:$4 sm:$0xff]  }
 0x370   :  { %3017 = vmatpush3.bf16.msra.mxu1 %v3460_v5  ;;  %2503 = vmatprep.subr.bf16.mxu0 %v3463_v6  ;;  %v3537_v5 = vld [vmem:[#allocation10 + $0x630] ss:$28 sps:$4 sm:$0xff]  }
 0x371   :  { %3024 = vmatprep.subr.bf16.mxu1 %v3464_v7  ;;  %v3542_v6 = vld [vmem:[#allocation10 + $0x66c] ss:$28 sps:$4 sm:$0xff]  }
 0x372   :  { %v3540_v7 = vld [vmem:[#allocation10 + $0x668] ss:$28 sps:$4 sm:$0xff]  }
 0x373   :  { %2602 = vmatmul.mubr.bf16.vlgmr.msra.gmra.mrb[16].mxu1 %v3870_v22  ;;  %2504 = vmatpush1.bf16.msra.mxu0 %v3461_v8  ;;  %v3545_v8 = vld [vmem:[#allocation10 + $0x6a4] ss:$28 sps:$4 sm:$0xff]  }
 0x374   :  { %3025 = vmatpush3.bf16.msra.mxu1 %v3465_v9  ;;  %2641 = vmatprep.mubr.bf16.mxu1 %v3874_v25  ;;  %v3543_v9 = vld [vmem:[#allocation10 + $0x6a0] ss:$28 sps:$4 sm:$0xff]  }
 0x375   :  { %2505 = vmatprep.subr.bf16.mxu0 %v3468_v10  ;;  %3026 = vmatprep.subr.bf16.mxu1 %v3469_v11  ;;  %v3548_v10 = vld [vmem:[#allocation10 + $0x6dc] ss:$28 sps:$4 sm:$0xff]  }
 0x376   :  { %v3546_v11 = vld [vmem:[#allocation10 + $0x6d8] ss:$28 sps:$4 sm:$0xff]  }
 0x377   :  { %2506 = vmatpush1.bf16.msra.mxu0 %v3466_v13  ;;  %v1134_v13 = vld [vmem:[%s3929_s8] sm:$0xff]  ;;  %s3719_s8 = smov [#allocation11]  }
 0x378   :  { %3027 = vmatpush3.bf16.msra.mxu1 %v3470_v14  ;;  %2507 = vmatprep.subr.bf16.mxu0 %v3473_v15  ;;  %v1139_v14 = vrot.slane %v1134_v13, %v3843_v41  ;;  %v1147_v15 = vrot.slane %v1134_v13, %v450_v12  ;;  %s2669_s1 = sshll.u32 %s3719_s8, 4  ;;  %s2670_s1 = int_to_ptr.vmem [resolvable:$true] %s2669_s1 }
 0x379   :  { %3028 = vmatprep.subr.bf16.mxu1 %v3474_v16  ;;  %v1143_v16 = vrot.slane %v1134_v13, %v3849_v43  ;;  %s3673_s10 = scalar_lea.vmem %s2670_s1, 896  ;;  %p3678_p13 = scmp.lt.s32.totalorder %s2670_s1, %s2670_s1 }
 0x37a   :  { %p3674_p12 = scmp.ne.s32.totalorder %s2670_s1, %s3673_s10  ;;  %p3679_p0 = scmp.lt.s32.totalorder %s3673_s10, %s3673_s10 }
 0x37b   :  { %2508 = vmatpush1.bf16.msra.mxu0 %v3471_v17  ;;  %v1151_v17 = vrot.slane %v1134_v13, %v454_v62 }
 0x37c   :  { %3029 = vmatpush3.bf16.msra.mxu1 %v3475_v19  ;;  %2509 = vmatprep.subr.bf16.mxu0 %v3478_v20  ;;  %p3680_p1 = por %p3679_p0, %p3678_p13 }
 0x37d   :  { %3030 = vmatprep.subr.bf16.mxu1 %v3479_v21 }
 0x37e   :  { %p3681_p2 = pnand %p3680_p1, %p3674_p12 }
 0x37f   :  { %2510 = vmatpush1.bf16.msra.mxu0 %v3476_v23 }
 0x380   :  { %3031 = vmatpush3.bf16.msra.mxu1 %v3480_v24  ;;  %2511 = vmatprep.subr.bf16.mxu0 %v3483_v26 }
 0x381   :  { %3032 = vmatprep.subr.bf16.mxu1 %v3484_v27 }
 0x383   :  { %2512 = vmatpush1.bf16.msra.mxu0 %v3481_v28 }
 0x384   :  { %3033 = vmatpush3.bf16.msra.mxu1 %v3485_v29  ;;  %2513 = vmatprep.subr.bf16.mxu0 %v3488_v30 }
 0x385   :  { %3034 = vmatprep.subr.bf16.mxu1 %v3489_v61 }
 0x387   :  { %2514 = vmatpush1.bf16.msra.mxu0 %v3486_v31 }
 0x388   :  { %3035 = vmatpush3.bf16.msra.mxu1 %v3490_v32  ;;  %2515 = vmatprep.subr.bf16.mxu0 %v3493_v33 }
 0x389   :  { %3036 = vmatprep.subr.bf16.mxu1 %v3494_v34 }
 0x38b   :  { %2516 = vmatpush1.bf16.msra.mxu0 %v3491_v3 }
 0x38c   :  { %3037 = vmatpush3.bf16.msra.mxu1 %v3495_v36  ;;  %2517 = vmatprep.subr.bf16.mxu0 %v3498_v37  ;;  %v1162_v36 = vsub.s32 6, %v3840_v40 }
 0x38d   :  { %3038 = vmatprep.subr.bf16.mxu1 %v3499_v38 }
 0x38e   :  { %v1163_v37 = vrot.slane %v1134_v13, %v1162_v36 }
 0x38f   :  { %2518 = vmatpush1.bf16.msra.mxu0 %v3496_v39 }
 0x390   :  { %3039 = vmatpush3.bf16.msra.mxu1 %v3500_v42  ;;  %2528 = vmatprep.subr.bf16.mxu0 %v3503_v44 }
 0x392   :  { %2520 = vmatmul.mubr.bf16.vlgmr.msra.gmra.mrb[8].mxu0 %v3870_v22  ;;  %v3518_v22 = vld [vmem:[#allocation10 + $0x4ac] ss:$28 sps:$4 sm:$0xff]  }
 0x393   :  { %2642 = vmatmul.mubr.bf16.vlgmr.msra.gmra.mrb[20].mxu1 %v3885_v35  ;;  %2529 = vmatpush1.bf16.msra.mxu0 %v3501_v45 }
 0x394   :  { %2560 = vmatprep.mubr.bf16.mxu0 %v3874_v25  ;;  %2530 = vmatprep.subr.bf16.mxu0 %v3506_v46  ;;  %v3519_v25 = vld [vmem:[#allocation10 + $0x4e0] ss:$28 sps:$4 sm:$0xff]  }
 0x397   :  { %2531 = vmatpush1.bf16.msra.mxu0 %v3504_v47 }
 0x398   :  { %2532 = vmatprep.subr.bf16.mxu0 %v3509_v48 }
 0x39b   :  { %2533 = vmatpush1.bf16.msra.mxu0 %v3507_v49  ;;  %v1154_v49 = vsub.s32 4, %v3840_v40 }
 0x39c   :  { %2534 = vmatprep.subr.bf16.mxu0 %v3512_v50  ;;  %v1158_v50 = vsub.s32 5, %v3840_v40 }
 0x39f   :  { %2535 = vmatpush1.bf16.msra.mxu0 %v3510_v51  ;;  %v1155_v51 = vrot.slane %v1134_v13, %v1154_v49 }
 0x3a0   :  { %2536 = vmatprep.subr.bf16.mxu0 %v3515_v52  ;;  %v1159_v52 = vrot.slane %v1134_v13, %v1158_v50 }
 0x3a3   :  { %2537 = vmatpush1.bf16.msra.mxu0 %v3513_v18 }
 0x3a4   :  { %2538 = vmatprep.subr.bf16.mxu0 %v3518_v22 }
 0x3a7   :  { %2539 = vmatpush1.bf16.msra.mxu0 %v3516_v53 }
 0x3a8   :  { %2540 = vmatprep.subr.bf16.mxu0 %v3521_v54 }
 0x3ab   :  { %2541 = vmatpush1.bf16.msra.mxu0 %v3519_v25 }
 0x3ac   :  { %2542 = vmatprep.subr.bf16.mxu0 %v3524_v55 }
 0x3af   :  { %2543 = vmatpush1.bf16.msra.mxu0 %v3522_v56 }
 0x3b0   :  { %2544 = vmatprep.subr.bf16.mxu0 %v3527_v57 }
 0x3b3   :  { %2545 = vmatpush1.bf16.msra.mxu0 %v3525_v58 }
 0x3b4   :  { %2546 = vmatprep.subr.bf16.mxu0 %v3530_v59 }
 0x3b7   :  { %2547 = vmatpush1.bf16.msra.mxu0 %v3528_v60 }
 0x3b8   :  { %2548 = vmatprep.subr.bf16.mxu0 %v3533_v63 }
 0x3bb   :  { %2549 = vmatpush1.bf16.msra.mxu0 %v3531_v0 }
 0x3bc   :  { %2550 = vmatprep.subr.bf16.mxu0 %v3536_v1 }
 0x3bf   :  { %2551 = vmatpush1.bf16.msra.mxu0 %v3534_v2 }
 0x3c0   :  { %2552 = vmatprep.subr.bf16.mxu0 %v3539_v4 }
 0x3c3   :  { %2553 = vmatpush1.bf16.msra.mxu0 %v3537_v5 }
 0x3c4   :  { %2554 = vmatprep.subr.bf16.mxu0 %v3542_v6 }
 0x3c7   :  { %2555 = vmatpush1.bf16.msra.mxu0 %v3540_v7 }
 0x3c8   :  { %2556 = vmatprep.subr.bf16.mxu0 %v3545_v8 }
 0x3cb   :  { %2557 = vmatpush1.bf16.msra.mxu0 %v3543_v9 }
 0x3cc   :  { %2558 = vmatprep.subr.bf16.mxu0 %v3548_v10 }
 0x3cf   :  { %2559 = vmatpush1.bf16.msra.mxu0 %v3546_v11 }
 0x3d2   :  { %2561 = vmatmul.mubr.bf16.vlgmr.msra.gmra.mrb[8].mxu0 %v3885_v35 }
 0x425   :  { %v2398_v19 = vpop.f32.mrb[4].mxu0  ;;  %v2480_v20 = vpop.f32.mrb[12].mxu1 }
 0x426   :  { %v3066_v21 = vadd.f32 %v2398_v19, %v1139_v14  ;;  %v3068_v23 = vadd.f32 %v2480_v20, %v1147_v15  ;;  %v2400_v24 = vpop.f32.mrb[5].mxu0  ;;  %v2482_v35 = vpop.f32.mrb[13].mxu1 }
 0x427   :  { %v3067_v26 = vadd.f32 %v2400_v24, %v1143_v16  ;;  %v3069_v27 = vadd.f32 %v2482_v35, %v1151_v17  ;;  %v2402_v28 = vpop.f32.mrb[6].mxu0  ;;  %v2484_v29 = vpop.f32.mrb[14].mxu1 }
 0x428   :  { %3549 = vtanh.f32 %v3066_v21  ;;  %v2403_v41 = vpop.f32.mrb[7].mxu0  ;;  %v2485_v30 = vpop.f32.mrb[15].mxu1 }
 0x429   :  { %3551 = vtanh.f32 %v3068_v23 }
 0x42a   :  { %3553 = vtanh.f32 %v3067_v26 }
 0x42b   :  { %3555 = vtanh.f32 %v3069_v27 }
 0x432   :  { %v3550_v43 = vpop.eup %3549 }
 0x433   :  { %v3552_v12 = vpop.eup %3551  ;;  %2656 = vst [vmem:[#allocation11] sm:$0xff] %v3550_v43 }
 0x434   :  { %v3554_v62 = vpop.eup %3553  ;;  %2658 = vst [vmem:[#allocation11 + $0x10] sm:$0xff] %v3552_v12 }
 0x435   :  { %v3556_v61 = vpop.eup %3555  ;;  %2657 = vst [vmem:[#allocation11 + $0x8] sm:$0xff] %v3554_v62 }
 0x436   :  { %2659 = vst [vmem:[#allocation11 + $0x18] sm:$0xff] %v3556_v61 }
 0x446   :  { %v3018_v31 = vpop.f32.mrb[16].mxu1 }
 0x447   :  { %v3019_v32 = vpop.f32.mrb[17].mxu1 }
 0x448   :  { %v3020_v33 = vadd.f32 %v3019_v32, %v3018_v31  ;;  %v3021_v34 = vpop.f32.mrb[18].mxu1 }
 0x449   :  { %v3022_v3 = vpop.f32.mrb[19].mxu1 }
 0x44a   :  { %v2604_v42 = vadd.f32 %v3020_v33, %v1163_v37 }
 0x466   :  { %v3040_v38 = vpop.f32.mrb[20].mxu1 }
 0x467   :  { %v3041_v39 = vpop.f32.mrb[21].mxu1 }
 0x468   :  { %v3042_v44 = vadd.f32 %v3041_v39, %v3040_v38  ;;  %v3043_v45 = vpop.f32.mrb[22].mxu1 }
 0x469   :  { %v3044_v46 = vpop.f32.mrb[23].mxu1 }
 0x46a   :  { %v2644_v47 = vadd.f32 %v3042_v44, %v2604_v42 }
 0x46c   :  { %3557 = vtanh.f32 %v2644_v47 }
 0x476   :  { %v3558_v48 = vpop.eup %3557 }
 0x477   :  { %2662 = vst [vmem:[#allocation11 + $0x30] sm:$0xff] %v3558_v48 }
 0x4a5   :  { %v2562_v18 = vpop.f32.mrb[8].mxu0 }
 0x4a6   :  { %v3070_v22 = vadd.f32 %v2562_v18, %v1155_v51  ;;  %v2564_v53 = vpop.f32.mrb[9].mxu0 }
 0x4a7   :  { %v3071_v54 = vadd.f32 %v2564_v53, %v1159_v52  ;;  %v2566_v25 = vpop.f32.mrb[10].mxu0 }
 0x4a8   :  { %3559 = vtanh.f32 %v3070_v22  ;;  %v2567_v55 = vpop.f32.mrb[11].mxu0 }
 0x4a9   :  { %3561 = vtanh.f32 %v3071_v54 }
 0x4b2   :  { %v3560_v56 = vpop.eup %3559 }
 0x4b3   :  { %v3562_v57 = vpop.eup %3561  ;;  %2660 = vst [vmem:[#allocation11 + $0x20] sm:$0xff] %v3560_v56 }
 0x4b4   :  { %2661 = vst [vmem:[#allocation11 + $0x28] sm:$0xff] %v3562_v57 }
 0x4b5   :  { %3684 = shalt.err (!%p3681_p2)
}
 0x4b6   :  { %s3685_s14 = scalar_lea.hbm %s3930_s9, 896 }
 0x4b7   :  { %p3686_p3 = scmp.ne.s32.totalorder %s3930_s9, %s3685_s14  ;;  %p3689_p4 = scmp.lt.u32.totalorder %s3685_s14, %s3930_s9 }
 0x4b9   :  { %p3691_p5 = pnand %p3689_p4, %p3686_p3 }
 0x4bb   :  { %3694 = shalt.err (!%p3691_p5)
}
 0x4bc   :  { %2672 = dma.vmem_to_hbm [thread:$0]  %s2670_s1, 896, %s3930_s9, [#allocation4]  }
 0x4bd   :  { %3701 = dma.done.wait [#allocation4], 896  }
 0x4be   :  { %3702 = vsyncadd [#allocation4], 4294966400 }
 0x4bf   :  { %2676 = vsyncpa [#allocation3], 1 }
 0x4c0   :  { %2677 = vsyncpa [#allocation6], 1 }
 0x4c1   :  { %2678 = vsyncpa [#allocation9], 1 }
 0x4c2   :  { %2679 = vsyncpa [#allocation4], 1 }

</bundles_post_ra>
